<compile_context>
chip_gen: v7x
topology: tpu7x:2x2x1
jax: 0.10.0
libtpu: 0.0.40
codegen_flags: <defaults>
</compile_context>

<pallas_src>
import functools

import numpy as np
import jax
import jax.numpy as jnp
from jax.experimental import pallas as pl
from jax.experimental.pallas import tpu as pltpu


# ----- feature dimensionalities (mirrors the PyTorch module) -----------------
def get_atom_feature_dims():
    # standard OGB atom feature dims
    return [119, 4, 12, 12, 10, 6, 6, 2, 2]


def get_new_atom_feature_dims():
    return [7, 5, 90, 127, 2, 5, 7]


def get_enchanced_dims():
    return [*get_atom_feature_dims(), *get_new_atom_feature_dims()]


FULL_ATOM_FEATURE_DIMS = get_enchanced_dims()                      # 16 features
NUM_FEATURES = len(FULL_ATOM_FEATURE_DIMS)
OFFSETS = list(np.cumsum([0] + FULL_ATOM_FEATURE_DIMS[:-1]))       # static ints
TOTAL_VOCAB = int(sum(FULL_ATOM_FEATURE_DIMS))                     # 416 rows
LANE = 128
V_PAD = ((TOTAL_VOCAB + LANE - 1) // LANE) * LANE                  # 512 rows
NUM_CHUNKS = V_PAD // LANE                                         # 4 chunks


def _pack_features_into_chunks():
    """Bin-pack features (first-fit decreasing) into 128-row chunks so every
    feature's fused row range lies wholly inside one chunk -> exactly one
    lane-compare per feature in the kernel."""
    order = sorted(range(NUM_FEATURES), key=lambda i: -FULL_ATOM_FEATURE_DIMS[i])
    used = [0] * NUM_CHUNKS
    new_off = [0] * NUM_FEATURES
    for i in order:
        d = FULL_ATOM_FEATURE_DIMS[i]
        for c in range(NUM_CHUNKS):
            if used[c] + d <= LANE:
                new_off[i] = c * LANE + used[c]
                used[c] += d
                break
        else:
            raise AssertionError("chunk packing failed")
    return new_off


NEW_OFFSETS = _pack_features_into_chunks()                         # static ints
CHUNK_FEATS = [[i for i in range(NUM_FEATURES) if NEW_OFFSETS[i] // LANE == c]
               for c in range(NUM_CHUNKS)]
# new (chunk-aligned) row -> old (concatenated) row; TOTAL_VOCAB = zero pad row
ROW_PERM = np.full((V_PAD,), TOTAL_VOCAB, dtype=np.int32)
for _i in range(NUM_FEATURES):
    _d = FULL_ATOM_FEATURE_DIMS[_i]
    ROW_PERM[NEW_OFFSETS[_i]:NEW_OFFSETS[_i] + _d] = np.arange(
        OFFSETS[_i], OFFSETS[_i] + _d, dtype=np.int32)


def _round_up(x, m):
    return ((x + m - 1) // m) * m


# ----- Pallas kernel ----------------------------------------------------------
def atom_encoder_kernel(xp_ref, table_ref, out_ref, *, rowpack, f, e):
    """xp_ref:    (TR, rowpack*F) int32  -- rowpack consecutive nodes per row
       table_ref: (V_PAD, E)      f32    -- chunk-aligned, zero-padded table
       out_ref:   (TR, rowpack*E) f32    -- packed output, lane-dense."""
    xp = xp_ref[...]                                        # (TR, rowpack*F) int32
    tr = xp.shape[0]
    # lane index, hoisted once; compares fold (offset - chunk base) as constants.
    lane = jax.lax.broadcasted_iota(jnp.int32, (tr, LANE), 1)

    for j in range(rowpack):                                # node sub-position
        acc = jnp.zeros((tr, e), jnp.float32)
        for c, feats in enumerate(CHUNK_FEATS):             # 128-row table chunk
            if not feats:
                continue
            base = c * LANE
            hit = None
            for i in feats:
                col = j * f + i
                # chunk-aligned fused row ranges are disjoint within a chunk
                # -> boolean OR == one-hot sum.
                m = (xp[:, col:col + 1] + (NEW_OFFSETS[i] - base)) == lane
                hit = m if hit is None else jnp.logical_or(hit, m)
            counts = hit.astype(jnp.float32)                # exact {0,1}
            acc = acc + jnp.dot(counts,
                                table_ref[pl.ds(base, LANE), :],
                                preferred_element_type=jnp.float32)
        out_ref[:, j * e:(j + 1) * e] = acc


# ----- wrapper ---------------------------------------------------------------
def atom_encoder(x, fused_table, *, tn=1024):
    """x: (N, F) int32 raw categorical features (offsets folded in-kernel).
       fused_table: (V, E) f32 row-concatenated per-feature embedding tables."""
    n, f = x.shape
    assert f == NUM_FEATURES
    v, e = fused_table.shape
    assert v == TOTAL_VOCAB

    # Chunk-aligned, zero-padded table relayout (single wrapper-side gather,
    # 53 KB; padding rows read the appended zero row).
    table_z = jnp.concatenate(
        [fused_table.astype(jnp.float32), jnp.zeros((1, e), jnp.float32)], axis=0)
    table_packed = table_z[ROW_PERM]                        # (V_PAD, E)

    # Pack consecutive nodes into the lane dim so output stores are lane-dense.
    rowpack = (LANE // e) if (e < LANE and LANE % e == 0) else 1
    align = 8 * rowpack                                     # sublane-legal tile
    tn = max(align, min(_round_up(tn, align), _round_up(n, align)))
    n_pad = _round_up(n, tn)
    tr = tn // rowpack

    x_p = x.astype(jnp.int32)
    if n_pad != n:
        x_p = jnp.pad(x_p, ((0, n_pad - n), (0, 0)))        # index 0 is valid
    x_packed = x_p.reshape(n_pad // rowpack, rowpack * f)   # free: contiguous

    kernel = functools.partial(atom_encoder_kernel, rowpack=rowpack, f=f, e=e)

    out_packed = pl.pallas_call(
        kernel,
        out_shape=jax.ShapeDtypeStruct((n_pad // rowpack, rowpack * e), jnp.float32),
        grid=(n_pad // tn,),
        in_specs=[
            pl.BlockSpec((tr, rowpack * f), lambda i: (i, 0)),   # node tile (packed)
            # Constant index_map -> fetched once and resident across the grid.
            pl.BlockSpec((V_PAD, e), lambda i: (0, 0)),
        ],
        out_specs=pl.BlockSpec((tr, rowpack * e), lambda i: (i, 0)),
        compiler_params=pltpu.CompilerParams(
            dimension_semantics=("parallel",)),
    )(x_packed, table_packed)

    return out_packed.reshape(n_pad, e)[:n]


# ----- deterministic parameter init (xavier_uniform per table) ----------------
def init_tables(key, emb_dim):
    tables = []
    for i, dim in enumerate(FULL_ATOM_FEATURE_DIMS):
        k = jax.random.fold_in(key, i)
        bound = float(np.sqrt(6.0 / (dim + emb_dim)))       # torch xavier_uniform_
        tables.append(jax.random.uniform(
            k, (dim, emb_dim), jnp.float32, minval=-bound, maxval=bound))
    fused = jnp.concatenate(tables, axis=0)                 # (V, E)
    offsets = np.asarray(OFFSETS, dtype=np.int32)
    return fused, offsets


if __name__ == "__main__":
    key = jax.random.PRNGKey(0)
    emb_dim = 32
    n_nodes = 8

    fused_table, offsets = init_tables(jax.random.fold_in(key, 100), emb_dim)

    # build x with each column valid for its feature cardinality
    cols = []
    for i, dim in enumerate(FULL_ATOM_FEATURE_DIMS):
        kc = jax.random.fold_in(key, 200 + i)
        cols.append(jax.random.randint(kc, (n_nodes, 1), 0, dim, dtype=jnp.int32))
    x = jnp.concatenate(cols, axis=1)                       # (8, 16) int32

    out = atom_encoder(x, fused_table)
    out = jax.block_until_ready(out)

    # reference: plain gather-and-sum on the ORIGINAL concatenated table
    idx_ref = np.asarray(x) + offsets[None, :]
    ref = np.asarray(fused_table)[idx_ref].sum(axis=1)
    np.testing.assert_allclose(np.asarray(out), ref, rtol=1e-5, atol=1e-5)

    # TODO(synk): out-of-range raw indices are silently dropped by the one-hot
    # compare, whereas torch nn.Embedding would raise.

    print("KERNEL_OK")
</pallas_src>

<mosaic_0001>
module attributes {stable_mosaic.version = 11 : i64} {
  func.func @atom_encoder_kernel(%arg0: i32, %arg1: memref<8x64xi32, #tpu.memory_space<vmem>>, %arg2: memref<512x32xf32, #tpu.memory_space<vmem>>, %arg3: memref<8x128xf32, #tpu.memory_space<vmem>>) attributes {dimension_semantics = [#tpu.dimension_semantics<parallel>], iteration_bounds = array<i64: 1>, scalar_prefetch = 0 : i64, scratch_operands = 0 : i64, tpu.core_type = #tpu.core_type<tc>, window_params = [{transform_indices = @transform_0, window_bounds = array<i64: 8, 64>}, {pipeline_mode = #tpu.pipeline_mode<synchronous>, transform_indices = @transform_1, window_bounds = array<i64: 512, 32>}, {transform_indices = @transform_2, window_bounds = array<i64: 8, 128>}]} {
    %c0 = arith.constant 0 : index
    %c0_0 = arith.constant 0 : index
    %0 = vector.load %arg1[%c0, %c0_0] : memref<8x64xi32, #tpu.memory_space<vmem>>, vector<8x64xi32>
    %1 = tpu.iota {dimensions = array<i32: 1>} : vector<8x128xi32>
    %cst = arith.constant 0.000000e+00 : f32
    %2 = vector.broadcast %cst : f32 to vector<8x32xf32>
    %3 = vector.extract_strided_slice %0 {offsets = [0, 12], sizes = [8, 1], strides = [1, 1]} : vector<8x64xi32> to vector<8x1xi32>
    %c0_i32 = arith.constant 0 : i32
    %4 = vector.broadcast %c0_i32 : i32 to vector<8x1xi32>
    %5 = arith.addi %3, %4 : vector<8x1xi32>
    %6 = vector.broadcast %5 : vector<8x1xi32> to vector<8x128xi32>
    %7 = arith.cmpi eq, %6, %1 : vector<8x128xi32>
    %8 = arith.extui %7 : vector<8x128xi1> to vector<8x128xi32>
    %9 = arith.sitofp %8 : vector<8x128xi32> to vector<8x128xf32>
    %c0_1 = arith.constant 0 : index
    %c0_2 = arith.constant 0 : index
    %10 = vector.load %arg2[%c0_1, %c0_2] : memref<512x32xf32, #tpu.memory_space<vmem>>, vector<128x32xf32>
    %cst_3 = arith.constant dense<0.000000e+00> : vector<8x32xf32>
    %11 = tpu.matmul %9, %10, %cst_3 {dimension_numbers = #tpu.dot_dimension_numbers<[1], [0], [0], [1], [0, 0, 1, 1], [], []>} : vector<8x128xf32>, vector<128x32xf32>, vector<8x32xf32> -> vector<8x32xf32>
    %12 = arith.addf %2, %11 : vector<8x32xf32>
    %13 = vector.extract_strided_slice %0 {offsets = [0, 0], sizes = [8, 1], strides = [1, 1]} : vector<8x64xi32> to vector<8x1xi32>
    %c0_i32_4 = arith.constant 0 : i32
    %14 = vector.broadcast %c0_i32_4 : i32 to vector<8x1xi32>
    %15 = arith.addi %13, %14 : vector<8x1xi32>
    %16 = vector.broadcast %15 : vector<8x1xi32> to vector<8x128xi32>
    %17 = arith.cmpi eq, %16, %1 : vector<8x128xi32>
    %18 = vector.extract_strided_slice %0 {offsets = [0, 7], sizes = [8, 1], strides = [1, 1]} : vector<8x64xi32> to vector<8x1xi32>
    %c126_i32 = arith.constant 126 : i32
    %19 = vector.broadcast %c126_i32 : i32 to vector<8x1xi32>
    %20 = arith.addi %18, %19 : vector<8x1xi32>
    %21 = vector.broadcast %20 : vector<8x1xi32> to vector<8x128xi32>
    %22 = arith.cmpi eq, %21, %1 : vector<8x128xi32>
    %23 = arith.ori %17, %22 : vector<8x128xi1>
    %24 = vector.extract_strided_slice %0 {offsets = [0, 9], sizes = [8, 1], strides = [1, 1]} : vector<8x64xi32> to vector<8x1xi32>
    %c119_i32 = arith.constant 119 : i32
    %25 = vector.broadcast %c119_i32 : i32 to vector<8x1xi32>
    %26 = arith.addi %24, %25 : vector<8x1xi32>
    %27 = vector.broadcast %26 : vector<8x1xi32> to vector<8x128xi32>
    %28 = arith.cmpi eq, %27, %1 : vector<8x128xi32>
    %29 = arith.ori %23, %28 : vector<8x128xi1>
    %30 = arith.extui %29 : vector<8x128xi1> to vector<8x128xi32>
    %31 = arith.sitofp %30 : vector<8x128xi32> to vector<8x128xf32>
    %c128 = arith.constant 128 : index
    %c0_5 = arith.constant 0 : index
    %32 = vector.load %arg2[%c128, %c0_5] : memref<512x32xf32, #tpu.memory_space<vmem>>, vector<128x32xf32>
    %cst_6 = arith.constant dense<0.000000e+00> : vector<8x32xf32>
    %33 = tpu.matmul %31, %32, %cst_6 {dimension_numbers = #tpu.dot_dimension_numbers<[1], [0], [0], [1], [0, 0, 1, 1], [], []>} : vector<8x128xf32>, vector<128x32xf32>, vector<8x32xf32> -> vector<8x32xf32>
    %34 = arith.addf %12, %33 : vector<8x32xf32>
    %35 = vector.extract_strided_slice %0 {offsets = [0, 1], sizes = [8, 1], strides = [1, 1]} : vector<8x64xi32> to vector<8x1xi32>
    %c124_i32 = arith.constant 124 : i32
    %36 = vector.broadcast %c124_i32 : i32 to vector<8x1xi32>
    %37 = arith.addi %35, %36 : vector<8x1xi32>
    %38 = vector.broadcast %37 : vector<8x1xi32> to vector<8x128xi32>
    %39 = arith.cmpi eq, %38, %1 : vector<8x128xi32>
    %40 = vector.extract_strided_slice %0 {offsets = [0, 2], sizes = [8, 1], strides = [1, 1]} : vector<8x64xi32> to vector<8x1xi32>
    %c90_i32 = arith.constant 90 : i32
    %41 = vector.broadcast %c90_i32 : i32 to vector<8x1xi32>
    %42 = arith.addi %40, %41 : vector<8x1xi32>
    %43 = vector.broadcast %42 : vector<8x1xi32> to vector<8x128xi32>
    %44 = arith.cmpi eq, %43, %1 : vector<8x128xi32>
    %45 = arith.ori %39, %44 : vector<8x128xi1>
    %46 = vector.extract_strided_slice %0 {offsets = [0, 3], sizes = [8, 1], strides = [1, 1]} : vector<8x64xi32> to vector<8x1xi32>
    %c102_i32 = arith.constant 102 : i32
    %47 = vector.broadcast %c102_i32 : i32 to vector<8x1xi32>
    %48 = arith.addi %46, %47 : vector<8x1xi32>
    %49 = vector.broadcast %48 : vector<8x1xi32> to vector<8x128xi32>
    %50 = arith.cmpi eq, %49, %1 : vector<8x128xi32>
    %51 = arith.ori %45, %50 : vector<8x128xi1>
    %52 = vector.extract_strided_slice %0 {offsets = [0, 4], sizes = [8, 1], strides = [1, 1]} : vector<8x64xi32> to vector<8x1xi32>
    %c114_i32 = arith.constant 114 : i32
    %53 = vector.broadcast %c114_i32 : i32 to vector<8x1xi32>
    %54 = arith.addi %52, %53 : vector<8x1xi32>
    %55 = vector.broadcast %54 : vector<8x1xi32> to vector<8x128xi32>
    %56 = arith.cmpi eq, %55, %1 : vector<8x128xi32>
    %57 = arith.ori %51, %56 : vector<8x128xi1>
    %58 = vector.extract_strided_slice %0 {offsets = [0, 11], sizes = [8, 1], strides = [1, 1]} : vector<8x64xi32> to vector<8x1xi32>
    %c0_i32_7 = arith.constant 0 : i32
    %59 = vector.broadcast %c0_i32_7 : i32 to vector<8x1xi32>
    %60 = arith.addi %58, %59 : vector<8x1xi32>
    %61 = vector.broadcast %60 : vector<8x1xi32> to vector<8x128xi32>
    %62 = arith.cmpi eq, %61, %1 : vector<8x128xi32>
    %63 = arith.ori %57, %62 : vector<8x128xi1>
    %64 = arith.extui %63 : vector<8x128xi1> to vector<8x128xi32>
    %65 = arith.sitofp %64 : vector<8x128xi32> to vector<8x128xf32>
    %c256 = arith.constant 256 : index
    %c0_8 = arith.constant 0 : index
    %66 = vector.load %arg2[%c256, %c0_8] : memref<512x32xf32, #tpu.memory_space<vmem>>, vector<128x32xf32>
    %cst_9 = arith.constant dense<0.000000e+00> : vector<8x32xf32>
    %67 = tpu.matmul %65, %66, %cst_9 {dimension_numbers = #tpu.dot_dimension_numbers<[1], [0], [0], [1], [0, 0, 1, 1], [], []>} : vector<8x128xf32>, vector<128x32xf32>, vector<8x32xf32> -> vector<8x32xf32>
    %68 = arith.addf %34, %67 : vector<8x32xf32>
    %69 = vector.extract_strided_slice %0 {offsets = [0, 5], sizes = [8, 1], strides = [1, 1]} : vector<8x64xi32> to vector<8x1xi32>
    %c7_i32 = arith.constant 7 : i32
    %70 = vector.broadcast %c7_i32 : i32 to vector<8x1xi32>
    %71 = arith.addi %69, %70 : vector<8x1xi32>
    %72 = vector.broadcast %71 : vector<8x1xi32> to vector<8x128xi32>
    %73 = arith.cmpi eq, %72, %1 : vector<8x128xi32>
    %74 = vector.extract_strided_slice %0 {offsets = [0, 6], sizes = [8, 1], strides = [1, 1]} : vector<8x64xi32> to vector<8x1xi32>
    %c13_i32 = arith.constant 13 : i32
    %75 = vector.broadcast %c13_i32 : i32 to vector<8x1xi32>
    %76 = arith.addi %74, %75 : vector<8x1xi32>
    %77 = vector.broadcast %76 : vector<8x1xi32> to vector<8x128xi32>
    %78 = arith.cmpi eq, %77, %1 : vector<8x128xi32>
    %79 = arith.ori %73, %78 : vector<8x128xi1>
    %80 = vector.extract_strided_slice %0 {offsets = [0, 8], sizes = [8, 1], strides = [1, 1]} : vector<8x64xi32> to vector<8x1xi32>
    %c29_i32 = arith.constant 29 : i32
    %81 = vector.broadcast %c29_i32 : i32 to vector<8x1xi32>
    %82 = arith.addi %80, %81 : vector<8x1xi32>
    %83 = vector.broadcast %82 : vector<8x1xi32> to vector<8x128xi32>
    %84 = arith.cmpi eq, %83, %1 : vector<8x128xi32>
    %85 = arith.ori %79, %84 : vector<8x128xi1>
    %86 = vector.extract_strided_slice %0 {offsets = [0, 10], sizes = [8, 1], strides = [1, 1]} : vector<8x64xi32> to vector<8x1xi32>
    %c19_i32 = arith.constant 19 : i32
    %87 = vector.broadcast %c19_i32 : i32 to vector<8x1xi32>
    %88 = arith.addi %86, %87 : vector<8x1xi32>
    %89 = vector.broadcast %88 : vector<8x1xi32> to vector<8x128xi32>
    %90 = arith.cmpi eq, %89, %1 : vector<8x128xi32>
    %91 = arith.ori %85, %90 : vector<8x128xi1>
    %92 = vector.extract_strided_slice %0 {offsets = [0, 13], sizes = [8, 1], strides = [1, 1]} : vector<8x64xi32> to vector<8x1xi32>
    %c31_i32 = arith.constant 31 : i32
    %93 = vector.broadcast %c31_i32 : i32 to vector<8x1xi32>
    %94 = arith.addi %92, %93 : vector<8x1xi32>
    %95 = vector.broadcast %94 : vector<8x1xi32> to vector<8x128xi32>
    %96 = arith.cmpi eq, %95, %1 : vector<8x128xi32>
    %97 = arith.ori %91, %96 : vector<8x128xi1>
    %98 = vector.extract_strided_slice %0 {offsets = [0, 14], sizes = [8, 1], strides = [1, 1]} : vector<8x64xi32> to vector<8x1xi32>
    %c24_i32 = arith.constant 24 : i32
    %99 = vector.broadcast %c24_i32 : i32 to vector<8x1xi32>
    %100 = arith.addi %98, %99 : vector<8x1xi32>
    %101 = vector.broadcast %100 : vector<8x1xi32> to vector<8x128xi32>
    %102 = arith.cmpi eq, %101, %1 : vector<8x128xi32>
    %103 = arith.ori %97, %102 : vector<8x128xi1>
    %104 = vector.extract_strided_slice %0 {offsets = [0, 15], sizes = [8, 1], strides = [1, 1]} : vector<8x64xi32> to vector<8x1xi32>
    %c0_i32_10 = arith.constant 0 : i32
    %105 = vector.broadcast %c0_i32_10 : i32 to vector<8x1xi32>
    %106 = arith.addi %104, %105 : vector<8x1xi32>
    %107 = vector.broadcast %106 : vector<8x1xi32> to vector<8x128xi32>
    %108 = arith.cmpi eq, %107, %1 : vector<8x128xi32>
    %109 = arith.ori %103, %108 : vector<8x128xi1>
    %110 = arith.extui %109 : vector<8x128xi1> to vector<8x128xi32>
    %111 = arith.sitofp %110 : vector<8x128xi32> to vector<8x128xf32>
    %c384 = arith.constant 384 : index
    %c0_11 = arith.constant 0 : index
    %112 = vector.load %arg2[%c384, %c0_11] : memref<512x32xf32, #tpu.memory_space<vmem>>, vector<128x32xf32>
    %cst_12 = arith.constant dense<0.000000e+00> : vector<8x32xf32>
    %113 = tpu.matmul %111, %112, %cst_12 {dimension_numbers = #tpu.dot_dimension_numbers<[1], [0], [0], [1], [0, 0, 1, 1], [], []>} : vector<8x128xf32>, vector<128x32xf32>, vector<8x32xf32> -> vector<8x32xf32>
    %114 = arith.addf %68, %113 : vector<8x32xf32>
    %c0_13 = arith.constant 0 : index
    %c0_14 = arith.constant 0 : index
    %115 = vector.load %arg3[%c0_13, %c0_14] : memref<8x128xf32, #tpu.memory_space<vmem>>, vector<8x32xf32>
    tpu.vector_store %arg3[%c0_13, %c0_14], %114 {strides = array<i32>} : memref<8x128xf32, #tpu.memory_space<vmem>>, vector<8x32xf32>,
    %cst_15 = arith.constant 0.000000e+00 : f32
    %116 = vector.broadcast %cst_15 : f32 to vector<8x32xf32>
    %117 = vector.extract_strided_slice %0 {offsets = [0, 28], sizes = [8, 1], strides = [1, 1]} : vector<8x64xi32> to vector<8x1xi32>
    %c0_i32_16 = arith.constant 0 : i32
    %118 = vector.broadcast %c0_i32_16 : i32 to vector<8x1xi32>
    %119 = arith.addi %117, %118 : vector<8x1xi32>
    %120 = vector.broadcast %119 : vector<8x1xi32> to vector<8x128xi32>
    %121 = arith.cmpi eq, %120, %1 : vector<8x128xi32>
    %122 = arith.extui %121 : vector<8x128xi1> to vector<8x128xi32>
    %123 = arith.sitofp %122 : vector<8x128xi32> to vector<8x128xf32>
    %c0_17 = arith.constant 0 : index
    %c0_18 = arith.constant 0 : index
    %124 = vector.load %arg2[%c0_17, %c0_18] : memref<512x32xf32, #tpu.memory_space<vmem>>, vector<128x32xf32>
    %cst_19 = arith.constant dense<0.000000e+00> : vector<8x32xf32>
    %125 = tpu.matmul %123, %124, %cst_19 {dimension_numbers = #tpu.dot_dimension_numbers<[1], [0], [0], [1], [0, 0, 1, 1], [], []>} : vector<8x128xf32>, vector<128x32xf32>, vector<8x32xf32> -> vector<8x32xf32>
    %126 = arith.addf %116, %125 : vector<8x32xf32>
    %127 = vector.extract_strided_slice %0 {offsets = [0, 16], sizes = [8, 1], strides = [1, 1]} : vector<8x64xi32> to vector<8x1xi32>
    %c0_i32_20 = arith.constant 0 : i32
    %128 = vector.broadcast %c0_i32_20 : i32 to vector<8x1xi32>
    %129 = arith.addi %127, %128 : vector<8x1xi32>
    %130 = vector.broadcast %129 : vector<8x1xi32> to vector<8x128xi32>
    %131 = arith.cmpi eq, %130, %1 : vector<8x128xi32>
    %132 = vector.extract_strided_slice %0 {offsets = [0, 23], sizes = [8, 1], strides = [1, 1]} : vector<8x64xi32> to vector<8x1xi32>
    %c126_i32_21 = arith.constant 126 : i32
    %133 = vector.broadcast %c126_i32_21 : i32 to vector<8x1xi32>
    %134 = arith.addi %132, %133 : vector<8x1xi32>
    %135 = vector.broadcast %134 : vector<8x1xi32> to vector<8x128xi32>
    %136 = arith.cmpi eq, %135, %1 : vector<8x128xi32>
    %137 = arith.ori %131, %136 : vector<8x128xi1>
    %138 = vector.extract_strided_slice %0 {offsets = [0, 25], sizes = [8, 1], strides = [1, 1]} : vector<8x64xi32> to vector<8x1xi32>
    %c119_i32_22 = arith.constant 119 : i32
    %139 = vector.broadcast %c119_i32_22 : i32 to vector<8x1xi32>
    %140 = arith.addi %138, %139 : vector<8x1xi32>
    %141 = vector.broadcast %140 : vector<8x1xi32> to vector<8x128xi32>
    %142 = arith.cmpi eq, %141, %1 : vector<8x128xi32>
    %143 = arith.ori %137, %142 : vector<8x128xi1>
    %144 = arith.extui %143 : vector<8x128xi1> to vector<8x128xi32>
    %145 = arith.sitofp %144 : vector<8x128xi32> to vector<8x128xf32>
    %c128_23 = arith.constant 128 : index
    %c0_24 = arith.constant 0 : index
    %146 = vector.load %arg2[%c128_23, %c0_24] : memref<512x32xf32, #tpu.memory_space<vmem>>, vector<128x32xf32>
    %cst_25 = arith.constant dense<0.000000e+00> : vector<8x32xf32>
    %147 = tpu.matmul %145, %146, %cst_25 {dimension_numbers = #tpu.dot_dimension_numbers<[1], [0], [0], [1], [0, 0, 1, 1], [], []>} : vector<8x128xf32>, vector<128x32xf32>, vector<8x32xf32> -> vector<8x32xf32>
    %148 = arith.addf %126, %147 : vector<8x32xf32>
    %149 = vector.extract_strided_slice %0 {offsets = [0, 17], sizes = [8, 1], strides = [1, 1]} : vector<8x64xi32> to vector<8x1xi32>
    %c124_i32_26 = arith.constant 124 : i32
    %150 = vector.broadcast %c124_i32_26 : i32 to vector<8x1xi32>
    %151 = arith.addi %149, %150 : vector<8x1xi32>
    %152 = vector.broadcast %151 : vector<8x1xi32> to vector<8x128xi32>
    %153 = arith.cmpi eq, %152, %1 : vector<8x128xi32>
    %154 = vector.extract_strided_slice %0 {offsets = [0, 18], sizes = [8, 1], strides = [1, 1]} : vector<8x64xi32> to vector<8x1xi32>
    %c90_i32_27 = arith.constant 90 : i32
    %155 = vector.broadcast %c90_i32_27 : i32 to vector<8x1xi32>
    %156 = arith.addi %154, %155 : vector<8x1xi32>
    %157 = vector.broadcast %156 : vector<8x1xi32> to vector<8x128xi32>
    %158 = arith.cmpi eq, %157, %1 : vector<8x128xi32>
    %159 = arith.ori %153, %158 : vector<8x128xi1>
    %160 = vector.extract_strided_slice %0 {offsets = [0, 19], sizes = [8, 1], strides = [1, 1]} : vector<8x64xi32> to vector<8x1xi32>
    %c102_i32_28 = arith.constant 102 : i32
    %161 = vector.broadcast %c102_i32_28 : i32 to vector<8x1xi32>
    %162 = arith.addi %160, %161 : vector<8x1xi32>
    %163 = vector.broadcast %162 : vector<8x1xi32> to vector<8x128xi32>
    %164 = arith.cmpi eq, %163, %1 : vector<8x128xi32>
    %165 = arith.ori %159, %164 : vector<8x128xi1>
    %166 = vector.extract_strided_slice %0 {offsets = [0, 20], sizes = [8, 1], strides = [1, 1]} : vector<8x64xi32> to vector<8x1xi32>
    %c114_i32_29 = arith.constant 114 : i32
    %167 = vector.broadcast %c114_i32_29 : i32 to vector<8x1xi32>
    %168 = arith.addi %166, %167 : vector<8x1xi32>
    %169 = vector.broadcast %168 : vector<8x1xi32> to vector<8x128xi32>
    %170 = arith.cmpi eq, %169, %1 : vector<8x128xi32>
    %171 = arith.ori %165, %170 : vector<8x128xi1>
    %172 = vector.extract_strided_slice %0 {offsets = [0, 27], sizes = [8, 1], strides = [1, 1]} : vector<8x64xi32> to vector<8x1xi32>
    %c0_i32_30 = arith.constant 0 : i32
    %173 = vector.broadcast %c0_i32_30 : i32 to vector<8x1xi32>
    %174 = arith.addi %172, %173 : vector<8x1xi32>
    %175 = vector.broadcast %174 : vector<8x1xi32> to vector<8x128xi32>
    %176 = arith.cmpi eq, %175, %1 : vector<8x128xi32>
    %177 = arith.ori %171, %176 : vector<8x128xi1>
    %178 = arith.extui %177 : vector<8x128xi1> to vector<8x128xi32>
    %179 = arith.sitofp %178 : vector<8x128xi32> to vector<8x128xf32>
    %c256_31 = arith.constant 256 : index
    %c0_32 = arith.constant 0 : index
    %180 = vector.load %arg2[%c256_31, %c0_32] : memref<512x32xf32, #tpu.memory_space<vmem>>, vector<128x32xf32>
    %cst_33 = arith.constant dense<0.000000e+00> : vector<8x32xf32>
    %181 = tpu.matmul %179, %180, %cst_33 {dimension_numbers = #tpu.dot_dimension_numbers<[1], [0], [0], [1], [0, 0, 1, 1], [], []>} : vector<8x128xf32>, vector<128x32xf32>, vector<8x32xf32> -> vector<8x32xf32>
    %182 = arith.addf %148, %181 : vector<8x32xf32>
    %183 = vector.extract_strided_slice %0 {offsets = [0, 21], sizes = [8, 1], strides = [1, 1]} : vector<8x64xi32> to vector<8x1xi32>
    %c7_i32_34 = arith.constant 7 : i32
    %184 = vector.broadcast %c7_i32_34 : i32 to vector<8x1xi32>
    %185 = arith.addi %183, %184 : vector<8x1xi32>
    %186 = vector.broadcast %185 : vector<8x1xi32> to vector<8x128xi32>
    %187 = arith.cmpi eq, %186, %1 : vector<8x128xi32>
    %188 = vector.extract_strided_slice %0 {offsets = [0, 22], sizes = [8, 1], strides = [1, 1]} : vector<8x64xi32> to vector<8x1xi32>
    %c13_i32_35 = arith.constant 13 : i32
    %189 = vector.broadcast %c13_i32_35 : i32 to vector<8x1xi32>
    %190 = arith.addi %188, %189 : vector<8x1xi32>
    %191 = vector.broadcast %190 : vector<8x1xi32> to vector<8x128xi32>
    %192 = arith.cmpi eq, %191, %1 : vector<8x128xi32>
    %193 = arith.ori %187, %192 : vector<8x128xi1>
    %194 = vector.extract_strided_slice %0 {offsets = [0, 24], sizes = [8, 1], strides = [1, 1]} : vector<8x64xi32> to vector<8x1xi32>
    %c29_i32_36 = arith.constant 29 : i32
    %195 = vector.broadcast %c29_i32_36 : i32 to vector<8x1xi32>
    %196 = arith.addi %194, %195 : vector<8x1xi32>
    %197 = vector.broadcast %196 : vector<8x1xi32> to vector<8x128xi32>
    %198 = arith.cmpi eq, %197, %1 : vector<8x128xi32>
    %199 = arith.ori %193, %198 : vector<8x128xi1>
    %200 = vector.extract_strided_slice %0 {offsets = [0, 26], sizes = [8, 1], strides = [1, 1]} : vector<8x64xi32> to vector<8x1xi32>
    %c19_i32_37 = arith.constant 19 : i32
    %201 = vector.broadcast %c19_i32_37 : i32 to vector<8x1xi32>
    %202 = arith.addi %200, %201 : vector<8x1xi32>
    %203 = vector.broadcast %202 : vector<8x1xi32> to vector<8x128xi32>
    %204 = arith.cmpi eq, %203, %1 : vector<8x128xi32>
    %205 = arith.ori %199, %204 : vector<8x128xi1>
    %206 = vector.extract_strided_slice %0 {offsets = [0, 29], sizes = [8, 1], strides = [1, 1]} : vector<8x64xi32> to vector<8x1xi32>
    %c31_i32_38 = arith.constant 31 : i32
    %207 = vector.broadcast %c31_i32_38 : i32 to vector<8x1xi32>
    %208 = arith.addi %206, %207 : vector<8x1xi32>
    %209 = vector.broadcast %208 : vector<8x1xi32> to vector<8x128xi32>
    %210 = arith.cmpi eq, %209, %1 : vector<8x128xi32>
    %211 = arith.ori %205, %210 : vector<8x128xi1>
    %212 = vector.extract_strided_slice %0 {offsets = [0, 30], sizes = [8, 1], strides = [1, 1]} : vector<8x64xi32> to vector<8x1xi32>
    %c24_i32_39 = arith.constant 24 : i32
    %213 = vector.broadcast %c24_i32_39 : i32 to vector<8x1xi32>
    %214 = arith.addi %212, %213 : vector<8x1xi32>
    %215 = vector.broadcast %214 : vector<8x1xi32> to vector<8x128xi32>
    %216 = arith.cmpi eq, %215, %1 : vector<8x128xi32>
    %217 = arith.ori %211, %216 : vector<8x128xi1>
    %218 = vector.extract_strided_slice %0 {offsets = [0, 31], sizes = [8, 1], strides = [1, 1]} : vector<8x64xi32> to vector<8x1xi32>
    %c0_i32_40 = arith.constant 0 : i32
    %219 = vector.broadcast %c0_i32_40 : i32 to vector<8x1xi32>
    %220 = arith.addi %218, %219 : vector<8x1xi32>
    %221 = vector.broadcast %220 : vector<8x1xi32> to vector<8x128xi32>
    %222 = arith.cmpi eq, %221, %1 : vector<8x128xi32>
    %223 = arith.ori %217, %222 : vector<8x128xi1>
    %224 = arith.extui %223 : vector<8x128xi1> to vector<8x128xi32>
    %225 = arith.sitofp %224 : vector<8x128xi32> to vector<8x128xf32>
    %c384_41 = arith.constant 384 : index
    %c0_42 = arith.constant 0 : index
    %226 = vector.load %arg2[%c384_41, %c0_42] : memref<512x32xf32, #tpu.memory_space<vmem>>, vector<128x32xf32>
    %cst_43 = arith.constant dense<0.000000e+00> : vector<8x32xf32>
    %227 = tpu.matmul %225, %226, %cst_43 {dimension_numbers = #tpu.dot_dimension_numbers<[1], [0], [0], [1], [0, 0, 1, 1], [], []>} : vector<8x128xf32>, vector<128x32xf32>, vector<8x32xf32> -> vector<8x32xf32>
    %228 = arith.addf %182, %227 : vector<8x32xf32>
    %c0_44 = arith.constant 0 : index
    %c32 = arith.constant 32 : index
    %229 = vector.load %arg3[%c0_44, %c32] : memref<8x128xf32, #tpu.memory_space<vmem>>, vector<8x32xf32>
    tpu.vector_store %arg3[%c0_44, %c32], %228 {strides = array<i32>} : memref<8x128xf32, #tpu.memory_space<vmem>>, vector<8x32xf32>,
    %cst_45 = arith.constant 0.000000e+00 : f32
    %230 = vector.broadcast %cst_45 : f32 to vector<8x32xf32>
    %231 = vector.extract_strided_slice %0 {offsets = [0, 44], sizes = [8, 1], strides = [1, 1]} : vector<8x64xi32> to vector<8x1xi32>
    %c0_i32_46 = arith.constant 0 : i32
    %232 = vector.broadcast %c0_i32_46 : i32 to vector<8x1xi32>
    %233 = arith.addi %231, %232 : vector<8x1xi32>
    %234 = vector.broadcast %233 : vector<8x1xi32> to vector<8x128xi32>
    %235 = arith.cmpi eq, %234, %1 : vector<8x128xi32>
    %236 = arith.extui %235 : vector<8x128xi1> to vector<8x128xi32>
    %237 = arith.sitofp %236 : vector<8x128xi32> to vector<8x128xf32>
    %c0_47 = arith.constant 0 : index
    %c0_48 = arith.constant 0 : index
    %238 = vector.load %arg2[%c0_47, %c0_48] : memref<512x32xf32, #tpu.memory_space<vmem>>, vector<128x32xf32>
    %cst_49 = arith.constant dense<0.000000e+00> : vector<8x32xf32>
    %239 = tpu.matmul %237, %238, %cst_49 {dimension_numbers = #tpu.dot_dimension_numbers<[1], [0], [0], [1], [0, 0, 1, 1], [], []>} : vector<8x128xf32>, vector<128x32xf32>, vector<8x32xf32> -> vector<8x32xf32>
    %240 = arith.addf %230, %239 : vector<8x32xf32>
    %241 = vector.extract_strided_slice %0 {offsets = [0, 32], sizes = [8, 1], strides = [1, 1]} : vector<8x64xi32> to vector<8x1xi32>
    %c0_i32_50 = arith.constant 0 : i32
    %242 = vector.broadcast %c0_i32_50 : i32 to vector<8x1xi32>
    %243 = arith.addi %241, %242 : vector<8x1xi32>
    %244 = vector.broadcast %243 : vector<8x1xi32> to vector<8x128xi32>
    %245 = arith.cmpi eq, %244, %1 : vector<8x128xi32>
    %246 = vector.extract_strided_slice %0 {offsets = [0, 39], sizes = [8, 1], strides = [1, 1]} : vector<8x64xi32> to vector<8x1xi32>
    %c126_i32_51 = arith.constant 126 : i32
    %247 = vector.broadcast %c126_i32_51 : i32 to vector<8x1xi32>
    %248 = arith.addi %246, %247 : vector<8x1xi32>
    %249 = vector.broadcast %248 : vector<8x1xi32> to vector<8x128xi32>
    %250 = arith.cmpi eq, %249, %1 : vector<8x128xi32>
    %251 = arith.ori %245, %250 : vector<8x128xi1>
    %252 = vector.extract_strided_slice %0 {offsets = [0, 41], sizes = [8, 1], strides = [1, 1]} : vector<8x64xi32> to vector<8x1xi32>
    %c119_i32_52 = arith.constant 119 : i32
    %253 = vector.broadcast %c119_i32_52 : i32 to vector<8x1xi32>
    %254 = arith.addi %252, %253 : vector<8x1xi32>
    %255 = vector.broadcast %254 : vector<8x1xi32> to vector<8x128xi32>
    %256 = arith.cmpi eq, %255, %1 : vector<8x128xi32>
    %257 = arith.ori %251, %256 : vector<8x128xi1>
    %258 = arith.extui %257 : vector<8x128xi1> to vector<8x128xi32>
    %259 = arith.sitofp %258 : vector<8x128xi32> to vector<8x128xf32>
    %c128_53 = arith.constant 128 : index
    %c0_54 = arith.constant 0 : index
    %260 = vector.load %arg2[%c128_53, %c0_54] : memref<512x32xf32, #tpu.memory_space<vmem>>, vector<128x32xf32>
    %cst_55 = arith.constant dense<0.000000e+00> : vector<8x32xf32>
    %261 = tpu.matmul %259, %260, %cst_55 {dimension_numbers = #tpu.dot_dimension_numbers<[1], [0], [0], [1], [0, 0, 1, 1], [], []>} : vector<8x128xf32>, vector<128x32xf32>, vector<8x32xf32> -> vector<8x32xf32>
    %262 = arith.addf %240, %261 : vector<8x32xf32>
    %263 = vector.extract_strided_slice %0 {offsets = [0, 33], sizes = [8, 1], strides = [1, 1]} : vector<8x64xi32> to vector<8x1xi32>
    %c124_i32_56 = arith.constant 124 : i32
    %264 = vector.broadcast %c124_i32_56 : i32 to vector<8x1xi32>
    %265 = arith.addi %263, %264 : vector<8x1xi32>
    %266 = vector.broadcast %265 : vector<8x1xi32> to vector<8x128xi32>
    %267 = arith.cmpi eq, %266, %1 : vector<8x128xi32>
    %268 = vector.extract_strided_slice %0 {offsets = [0, 34], sizes = [8, 1], strides = [1, 1]} : vector<8x64xi32> to vector<8x1xi32>
    %c90_i32_57 = arith.constant 90 : i32
    %269 = vector.broadcast %c90_i32_57 : i32 to vector<8x1xi32>
    %270 = arith.addi %268, %269 : vector<8x1xi32>
    %271 = vector.broadcast %270 : vector<8x1xi32> to vector<8x128xi32>
    %272 = arith.cmpi eq, %271, %1 : vector<8x128xi32>
    %273 = arith.ori %267, %272 : vector<8x128xi1>
    %274 = vector.extract_strided_slice %0 {offsets = [0, 35], sizes = [8, 1], strides = [1, 1]} : vector<8x64xi32> to vector<8x1xi32>
    %c102_i32_58 = arith.constant 102 : i32
    %275 = vector.broadcast %c102_i32_58 : i32 to vector<8x1xi32>
    %276 = arith.addi %274, %275 : vector<8x1xi32>
    %277 = vector.broadcast %276 : vector<8x1xi32> to vector<8x128xi32>
    %278 = arith.cmpi eq, %277, %1 : vector<8x128xi32>
    %279 = arith.ori %273, %278 : vector<8x128xi1>
    %280 = vector.extract_strided_slice %0 {offsets = [0, 36], sizes = [8, 1], strides = [1, 1]} : vector<8x64xi32> to vector<8x1xi32>
    %c114_i32_59 = arith.constant 114 : i32
    %281 = vector.broadcast %c114_i32_59 : i32 to vector<8x1xi32>
    %282 = arith.addi %280, %281 : vector<8x1xi32>
    %283 = vector.broadcast %282 : vector<8x1xi32> to vector<8x128xi32>
    %284 = arith.cmpi eq, %283, %1 : vector<8x128xi32>
    %285 = arith.ori %279, %284 : vector<8x128xi1>
    %286 = vector.extract_strided_slice %0 {offsets = [0, 43], sizes = [8, 1], strides = [1, 1]} : vector<8x64xi32> to vector<8x1xi32>
    %c0_i32_60 = arith.constant 0 : i32
    %287 = vector.broadcast %c0_i32_60 : i32 to vector<8x1xi32>
    %288 = arith.addi %286, %287 : vector<8x1xi32>
    %289 = vector.broadcast %288 : vector<8x1xi32> to vector<8x128xi32>
    %290 = arith.cmpi eq, %289, %1 : vector<8x128xi32>
    %291 = arith.ori %285, %290 : vector<8x128xi1>
    %292 = arith.extui %291 : vector<8x128xi1> to vector<8x128xi32>
    %293 = arith.sitofp %292 : vector<8x128xi32> to vector<8x128xf32>
    %c256_61 = arith.constant 256 : index
    %c0_62 = arith.constant 0 : index
    %294 = vector.load %arg2[%c256_61, %c0_62] : memref<512x32xf32, #tpu.memory_space<vmem>>, vector<128x32xf32>
    %cst_63 = arith.constant dense<0.000000e+00> : vector<8x32xf32>
    %295 = tpu.matmul %293, %294, %cst_63 {dimension_numbers = #tpu.dot_dimension_numbers<[1], [0], [0], [1], [0, 0, 1, 1], [], []>} : vector<8x128xf32>, vector<128x32xf32>, vector<8x32xf32> -> vector<8x32xf32>
    %296 = arith.addf %262, %295 : vector<8x32xf32>
    %297 = vector.extract_strided_slice %0 {offsets = [0, 37], sizes = [8, 1], strides = [1, 1]} : vector<8x64xi32> to vector<8x1xi32>
    %c7_i32_64 = arith.constant 7 : i32
    %298 = vector.broadcast %c7_i32_64 : i32 to vector<8x1xi32>
    %299 = arith.addi %297, %298 : vector<8x1xi32>
    %300 = vector.broadcast %299 : vector<8x1xi32> to vector<8x128xi32>
    %301 = arith.cmpi eq, %300, %1 : vector<8x128xi32>
    %302 = vector.extract_strided_slice %0 {offsets = [0, 38], sizes = [8, 1], strides = [1, 1]} : vector<8x64xi32> to vector<8x1xi32>
    %c13_i32_65 = arith.constant 13 : i32
    %303 = vector.broadcast %c13_i32_65 : i32 to vector<8x1xi32>
    %304 = arith.addi %302, %303 : vector<8x1xi32>
    %305 = vector.broadcast %304 : vector<8x1xi32> to vector<8x128xi32>
    %306 = arith.cmpi eq, %305, %1 : vector<8x128xi32>
    %307 = arith.ori %301, %306 : vector<8x128xi1>
    %308 = vector.extract_strided_slice %0 {offsets = [0, 40], sizes = [8, 1], strides = [1, 1]} : vector<8x64xi32> to vector<8x1xi32>
    %c29_i32_66 = arith.constant 29 : i32
    %309 = vector.broadcast %c29_i32_66 : i32 to vector<8x1xi32>
    %310 = arith.addi %308, %309 : vector<8x1xi32>
    %311 = vector.broadcast %310 : vector<8x1xi32> to vector<8x128xi32>
    %312 = arith.cmpi eq, %311, %1 : vector<8x128xi32>
    %313 = arith.ori %307, %312 : vector<8x128xi1>
    %314 = vector.extract_strided_slice %0 {offsets = [0, 42], sizes = [8, 1], strides = [1, 1]} : vector<8x64xi32> to vector<8x1xi32>
    %c19_i32_67 = arith.constant 19 : i32
    %315 = vector.broadcast %c19_i32_67 : i32 to vector<8x1xi32>
    %316 = arith.addi %314, %315 : vector<8x1xi32>
    %317 = vector.broadcast %316 : vector<8x1xi32> to vector<8x128xi32>
    %318 = arith.cmpi eq, %317, %1 : vector<8x128xi32>
    %319 = arith.ori %313, %318 : vector<8x128xi1>
    %320 = vector.extract_strided_slice %0 {offsets = [0, 45], sizes = [8, 1], strides = [1, 1]} : vector<8x64xi32> to vector<8x1xi32>
    %c31_i32_68 = arith.constant 31 : i32
    %321 = vector.broadcast %c31_i32_68 : i32 to vector<8x1xi32>
    %322 = arith.addi %320, %321 : vector<8x1xi32>
    %323 = vector.broadcast %322 : vector<8x1xi32> to vector<8x128xi32>
    %324 = arith.cmpi eq, %323, %1 : vector<8x128xi32>
    %325 = arith.ori %319, %324 : vector<8x128xi1>
    %326 = vector.extract_strided_slice %0 {offsets = [0, 46], sizes = [8, 1], strides = [1, 1]} : vector<8x64xi32> to vector<8x1xi32>
    %c24_i32_69 = arith.constant 24 : i32
    %327 = vector.broadcast %c24_i32_69 : i32 to vector<8x1xi32>
    %328 = arith.addi %326, %327 : vector<8x1xi32>
    %329 = vector.broadcast %328 : vector<8x1xi32> to vector<8x128xi32>
    %330 = arith.cmpi eq, %329, %1 : vector<8x128xi32>
    %331 = arith.ori %325, %330 : vector<8x128xi1>
    %332 = vector.extract_strided_slice %0 {offsets = [0, 47], sizes = [8, 1], strides = [1, 1]} : vector<8x64xi32> to vector<8x1xi32>
    %c0_i32_70 = arith.constant 0 : i32
    %333 = vector.broadcast %c0_i32_70 : i32 to vector<8x1xi32>
    %334 = arith.addi %332, %333 : vector<8x1xi32>
    %335 = vector.broadcast %334 : vector<8x1xi32> to vector<8x128xi32>
    %336 = arith.cmpi eq, %335, %1 : vector<8x128xi32>
    %337 = arith.ori %331, %336 : vector<8x128xi1>
    %338 = arith.extui %337 : vector<8x128xi1> to vector<8x128xi32>
    %339 = arith.sitofp %338 : vector<8x128xi32> to vector<8x128xf32>
    %c384_71 = arith.constant 384 : index
    %c0_72 = arith.constant 0 : index
    %340 = vector.load %arg2[%c384_71, %c0_72] : memref<512x32xf32, #tpu.memory_space<vmem>>, vector<128x32xf32>
    %cst_73 = arith.constant dense<0.000000e+00> : vector<8x32xf32>
    %341 = tpu.matmul %339, %340, %cst_73 {dimension_numbers = #tpu.dot_dimension_numbers<[1], [0], [0], [1], [0, 0, 1, 1], [], []>} : vector<8x128xf32>, vector<128x32xf32>, vector<8x32xf32> -> vector<8x32xf32>
    %342 = arith.addf %296, %341 : vector<8x32xf32>
    %c0_74 = arith.constant 0 : index
    %c64 = arith.constant 64 : index
    %343 = vector.load %arg3[%c0_74, %c64] : memref<8x128xf32, #tpu.memory_space<vmem>>, vector<8x32xf32>
    tpu.vector_store %arg3[%c0_74, %c64], %342 {strides = array<i32>} : memref<8x128xf32, #tpu.memory_space<vmem>>, vector<8x32xf32>,
    %cst_75 = arith.constant 0.000000e+00 : f32
    %344 = vector.broadcast %cst_75 : f32 to vector<8x32xf32>
    %345 = vector.extract_strided_slice %0 {offsets = [0, 60], sizes = [8, 1], strides = [1, 1]} : vector<8x64xi32> to vector<8x1xi32>
    %c0_i32_76 = arith.constant 0 : i32
    %346 = vector.broadcast %c0_i32_76 : i32 to vector<8x1xi32>
    %347 = arith.addi %345, %346 : vector<8x1xi32>
    %348 = vector.broadcast %347 : vector<8x1xi32> to vector<8x128xi32>
    %349 = arith.cmpi eq, %348, %1 : vector<8x128xi32>
    %350 = arith.extui %349 : vector<8x128xi1> to vector<8x128xi32>
    %351 = arith.sitofp %350 : vector<8x128xi32> to vector<8x128xf32>
    %c0_77 = arith.constant 0 : index
    %c0_78 = arith.constant 0 : index
    %352 = vector.load %arg2[%c0_77, %c0_78] : memref<512x32xf32, #tpu.memory_space<vmem>>, vector<128x32xf32>
    %cst_79 = arith.constant dense<0.000000e+00> : vector<8x32xf32>
    %353 = tpu.matmul %351, %352, %cst_79 {dimension_numbers = #tpu.dot_dimension_numbers<[1], [0], [0], [1], [0, 0, 1, 1], [], []>} : vector<8x128xf32>, vector<128x32xf32>, vector<8x32xf32> -> vector<8x32xf32>
    %354 = arith.addf %344, %353 : vector<8x32xf32>
    %355 = vector.extract_strided_slice %0 {offsets = [0, 48], sizes = [8, 1], strides = [1, 1]} : vector<8x64xi32> to vector<8x1xi32>
    %c0_i32_80 = arith.constant 0 : i32
    %356 = vector.broadcast %c0_i32_80 : i32 to vector<8x1xi32>
    %357 = arith.addi %355, %356 : vector<8x1xi32>
    %358 = vector.broadcast %357 : vector<8x1xi32> to vector<8x128xi32>
    %359 = arith.cmpi eq, %358, %1 : vector<8x128xi32>
    %360 = vector.extract_strided_slice %0 {offsets = [0, 55], sizes = [8, 1], strides = [1, 1]} : vector<8x64xi32> to vector<8x1xi32>
    %c126_i32_81 = arith.constant 126 : i32
    %361 = vector.broadcast %c126_i32_81 : i32 to vector<8x1xi32>
    %362 = arith.addi %360, %361 : vector<8x1xi32>
    %363 = vector.broadcast %362 : vector<8x1xi32> to vector<8x128xi32>
    %364 = arith.cmpi eq, %363, %1 : vector<8x128xi32>
    %365 = arith.ori %359, %364 : vector<8x128xi1>
    %366 = vector.extract_strided_slice %0 {offsets = [0, 57], sizes = [8, 1], strides = [1, 1]} : vector<8x64xi32> to vector<8x1xi32>
    %c119_i32_82 = arith.constant 119 : i32
    %367 = vector.broadcast %c119_i32_82 : i32 to vector<8x1xi32>
    %368 = arith.addi %366, %367 : vector<8x1xi32>
    %369 = vector.broadcast %368 : vector<8x1xi32> to vector<8x128xi32>
    %370 = arith.cmpi eq, %369, %1 : vector<8x128xi32>
    %371 = arith.ori %365, %370 : vector<8x128xi1>
    %372 = arith.extui %371 : vector<8x128xi1> to vector<8x128xi32>
    %373 = arith.sitofp %372 : vector<8x128xi32> to vector<8x128xf32>
    %c128_83 = arith.constant 128 : index
    %c0_84 = arith.constant 0 : index
    %374 = vector.load %arg2[%c128_83, %c0_84] : memref<512x32xf32, #tpu.memory_space<vmem>>, vector<128x32xf32>
    %cst_85 = arith.constant dense<0.000000e+00> : vector<8x32xf32>
    %375 = tpu.matmul %373, %374, %cst_85 {dimension_numbers = #tpu.dot_dimension_numbers<[1], [0], [0], [1], [0, 0, 1, 1], [], []>} : vector<8x128xf32>, vector<128x32xf32>, vector<8x32xf32> -> vector<8x32xf32>
    %376 = arith.addf %354, %375 : vector<8x32xf32>
    %377 = vector.extract_strided_slice %0 {offsets = [0, 49], sizes = [8, 1], strides = [1, 1]} : vector<8x64xi32> to vector<8x1xi32>
    %c124_i32_86 = arith.constant 124 : i32
    %378 = vector.broadcast %c124_i32_86 : i32 to vector<8x1xi32>
    %379 = arith.addi %377, %378 : vector<8x1xi32>
    %380 = vector.broadcast %379 : vector<8x1xi32> to vector<8x128xi32>
    %381 = arith.cmpi eq, %380, %1 : vector<8x128xi32>
    %382 = vector.extract_strided_slice %0 {offsets = [0, 50], sizes = [8, 1], strides = [1, 1]} : vector<8x64xi32> to vector<8x1xi32>
    %c90_i32_87 = arith.constant 90 : i32
    %383 = vector.broadcast %c90_i32_87 : i32 to vector<8x1xi32>
    %384 = arith.addi %382, %383 : vector<8x1xi32>
    %385 = vector.broadcast %384 : vector<8x1xi32> to vector<8x128xi32>
    %386 = arith.cmpi eq, %385, %1 : vector<8x128xi32>
    %387 = arith.ori %381, %386 : vector<8x128xi1>
    %388 = vector.extract_strided_slice %0 {offsets = [0, 51], sizes = [8, 1], strides = [1, 1]} : vector<8x64xi32> to vector<8x1xi32>
    %c102_i32_88 = arith.constant 102 : i32
    %389 = vector.broadcast %c102_i32_88 : i32 to vector<8x1xi32>
    %390 = arith.addi %388, %389 : vector<8x1xi32>
    %391 = vector.broadcast %390 : vector<8x1xi32> to vector<8x128xi32>
    %392 = arith.cmpi eq, %391, %1 : vector<8x128xi32>
    %393 = arith.ori %387, %392 : vector<8x128xi1>
    %394 = vector.extract_strided_slice %0 {offsets = [0, 52], sizes = [8, 1], strides = [1, 1]} : vector<8x64xi32> to vector<8x1xi32>
    %c114_i32_89 = arith.constant 114 : i32
    %395 = vector.broadcast %c114_i32_89 : i32 to vector<8x1xi32>
    %396 = arith.addi %394, %395 : vector<8x1xi32>
    %397 = vector.broadcast %396 : vector<8x1xi32> to vector<8x128xi32>
    %398 = arith.cmpi eq, %397, %1 : vector<8x128xi32>
    %399 = arith.ori %393, %398 : vector<8x128xi1>
    %400 = vector.extract_strided_slice %0 {offsets = [0, 59], sizes = [8, 1], strides = [1, 1]} : vector<8x64xi32> to vector<8x1xi32>
    %c0_i32_90 = arith.constant 0 : i32
    %401 = vector.broadcast %c0_i32_90 : i32 to vector<8x1xi32>
    %402 = arith.addi %400, %401 : vector<8x1xi32>
    %403 = vector.broadcast %402 : vector<8x1xi32> to vector<8x128xi32>
    %404 = arith.cmpi eq, %403, %1 : vector<8x128xi32>
    %405 = arith.ori %399, %404 : vector<8x128xi1>
    %406 = arith.extui %405 : vector<8x128xi1> to vector<8x128xi32>
    %407 = arith.sitofp %406 : vector<8x128xi32> to vector<8x128xf32>
    %c256_91 = arith.constant 256 : index
    %c0_92 = arith.constant 0 : index
    %408 = vector.load %arg2[%c256_91, %c0_92] : memref<512x32xf32, #tpu.memory_space<vmem>>, vector<128x32xf32>
    %cst_93 = arith.constant dense<0.000000e+00> : vector<8x32xf32>
    %409 = tpu.matmul %407, %408, %cst_93 {dimension_numbers = #tpu.dot_dimension_numbers<[1], [0], [0], [1], [0, 0, 1, 1], [], []>} : vector<8x128xf32>, vector<128x32xf32>, vector<8x32xf32> -> vector<8x32xf32>
    %410 = arith.addf %376, %409 : vector<8x32xf32>
    %411 = vector.extract_strided_slice %0 {offsets = [0, 53], sizes = [8, 1], strides = [1, 1]} : vector<8x64xi32> to vector<8x1xi32>
    %c7_i32_94 = arith.constant 7 : i32
    %412 = vector.broadcast %c7_i32_94 : i32 to vector<8x1xi32>
    %413 = arith.addi %411, %412 : vector<8x1xi32>
    %414 = vector.broadcast %413 : vector<8x1xi32> to vector<8x128xi32>
    %415 = arith.cmpi eq, %414, %1 : vector<8x128xi32>
    %416 = vector.extract_strided_slice %0 {offsets = [0, 54], sizes = [8, 1], strides = [1, 1]} : vector<8x64xi32> to vector<8x1xi32>
    %c13_i32_95 = arith.constant 13 : i32
    %417 = vector.broadcast %c13_i32_95 : i32 to vector<8x1xi32>
    %418 = arith.addi %416, %417 : vector<8x1xi32>
    %419 = vector.broadcast %418 : vector<8x1xi32> to vector<8x128xi32>
    %420 = arith.cmpi eq, %419, %1 : vector<8x128xi32>
    %421 = arith.ori %415, %420 : vector<8x128xi1>
    %422 = vector.extract_strided_slice %0 {offsets = [0, 56], sizes = [8, 1], strides = [1, 1]} : vector<8x64xi32> to vector<8x1xi32>
    %c29_i32_96 = arith.constant 29 : i32
    %423 = vector.broadcast %c29_i32_96 : i32 to vector<8x1xi32>
    %424 = arith.addi %422, %423 : vector<8x1xi32>
    %425 = vector.broadcast %424 : vector<8x1xi32> to vector<8x128xi32>
    %426 = arith.cmpi eq, %425, %1 : vector<8x128xi32>
    %427 = arith.ori %421, %426 : vector<8x128xi1>
    %428 = vector.extract_strided_slice %0 {offsets = [0, 58], sizes = [8, 1], strides = [1, 1]} : vector<8x64xi32> to vector<8x1xi32>
    %c19_i32_97 = arith.constant 19 : i32
    %429 = vector.broadcast %c19_i32_97 : i32 to vector<8x1xi32>
    %430 = arith.addi %428, %429 : vector<8x1xi32>
    %431 = vector.broadcast %430 : vector<8x1xi32> to vector<8x128xi32>
    %432 = arith.cmpi eq, %431, %1 : vector<8x128xi32>
    %433 = arith.ori %427, %432 : vector<8x128xi1>
    %434 = vector.extract_strided_slice %0 {offsets = [0, 61], sizes = [8, 1], strides = [1, 1]} : vector<8x64xi32> to vector<8x1xi32>
    %c31_i32_98 = arith.constant 31 : i32
    %435 = vector.broadcast %c31_i32_98 : i32 to vector<8x1xi32>
    %436 = arith.addi %434, %435 : vector<8x1xi32>
    %437 = vector.broadcast %436 : vector<8x1xi32> to vector<8x128xi32>
    %438 = arith.cmpi eq, %437, %1 : vector<8x128xi32>
    %439 = arith.ori %433, %438 : vector<8x128xi1>
    %440 = vector.extract_strided_slice %0 {offsets = [0, 62], sizes = [8, 1], strides = [1, 1]} : vector<8x64xi32> to vector<8x1xi32>
    %c24_i32_99 = arith.constant 24 : i32
    %441 = vector.broadcast %c24_i32_99 : i32 to vector<8x1xi32>
    %442 = arith.addi %440, %441 : vector<8x1xi32>
    %443 = vector.broadcast %442 : vector<8x1xi32> to vector<8x128xi32>
    %444 = arith.cmpi eq, %443, %1 : vector<8x128xi32>
    %445 = arith.ori %439, %444 : vector<8x128xi1>
    %446 = vector.extract_strided_slice %0 {offsets = [0, 63], sizes = [8, 1], strides = [1, 1]} : vector<8x64xi32> to vector<8x1xi32>
    %c0_i32_100 = arith.constant 0 : i32
    %447 = vector.broadcast %c0_i32_100 : i32 to vector<8x1xi32>
    %448 = arith.addi %446, %447 : vector<8x1xi32>
    %449 = vector.broadcast %448 : vector<8x1xi32> to vector<8x128xi32>
    %450 = arith.cmpi eq, %449, %1 : vector<8x128xi32>
    %451 = arith.ori %445, %450 : vector<8x128xi1>
    %452 = arith.extui %451 : vector<8x128xi1> to vector<8x128xi32>
    %453 = arith.sitofp %452 : vector<8x128xi32> to vector<8x128xf32>
    %c384_101 = arith.constant 384 : index
    %c0_102 = arith.constant 0 : index
    %454 = vector.load %arg2[%c384_101, %c0_102] : memref<512x32xf32, #tpu.memory_space<vmem>>, vector<128x32xf32>
    %cst_103 = arith.constant dense<0.000000e+00> : vector<8x32xf32>
    %455 = tpu.matmul %453, %454, %cst_103 {dimension_numbers = #tpu.dot_dimension_numbers<[1], [0], [0], [1], [0, 0, 1, 1], [], []>} : vector<8x128xf32>, vector<128x32xf32>, vector<8x32xf32> -> vector<8x32xf32>
    %456 = arith.addf %410, %455 : vector<8x32xf32>
    %c0_104 = arith.constant 0 : index
    %c96 = arith.constant 96 : index
    %457 = vector.load %arg3[%c0_104, %c96] : memref<8x128xf32, #tpu.memory_space<vmem>>, vector<8x32xf32>
    tpu.vector_store %arg3[%c0_104, %c96], %456 {strides = array<i32>} : memref<8x128xf32, #tpu.memory_space<vmem>>, vector<8x32xf32>,
    return
  }
  func.func @transform_0(%arg0: i32) -> (i32, i32) {
    %c0_i32 = arith.constant 0 : i32
    %c0_i32_0 = arith.constant 0 : i32
    return %arg0, %c0_i32 : i32, i32
  }
  func.func @transform_1(%arg0: i32) -> (i32, i32) {
    %c0_i32 = arith.constant 0 : i32
    %c0_i32_0 = arith.constant 0 : i32
    %c0_i32_1 = arith.constant 0 : i32
    return %c0_i32, %c0_i32_0 : i32, i32
  }
  func.func @transform_2(%arg0: i32) -> (i32, i32) {
    %c0_i32 = arith.constant 0 : i32
    %c0_i32_0 = arith.constant 0 : i32
    return %arg0, %c0_i32 : i32, i32
  }
}

</mosaic_0001>

<bundles_post_ra>
// kernel: tpu_custom_call.1
= control target key start
LH: loop header
LB: loop body
LE: loop exit
PB: predicated region body
PF: predicated region fallthrough
CT: control target
= control target key end

     0   :  { %v3206_v1 = vmov 0   ;;  %v3207_v2 = vmov 9   ;;  %v3208_v5 = vmov 7   ;;  %v3209_v6 = vmov 16   ;;  %s4130_s0 = inlined_call_operand.vmem [shape: s32[8,64], index: 0, kind: input, shape index: {}]   ;;  %s4131_s1 = inlined_call_operand.vmem [shape: f32[512,32], index: 1, kind: input, shape index: {}]   ;;  %s4132_s2 = inlined_call_operand.hbm [shape: f32[8,128], index: 2, kind: output, shape index: {}]  }
   0x1   :  { %v3296_v0 = vld [vmem:[%s4130_s0] sm:$0xff]  ;;  %3117 = vset.pattern.permute.xlu0 %v3206_v1  ;;  %3119 = vset.pattern.permute.xlu1 %v3207_v2  ;;  %v56_v8 = vld [vmem:[%s4131_s1 + $0x88] sm:$0xff] }
   0x2   :  { %v3299_v3 = vadd.s32 119, %v3296_v0  ;;  %38 = vperm.xlu0 %3117, %v3296_v0   ;;  %v3304_v4 = vadd.s32 126, %v3296_v0  ;;  %v55_v7 = vld [vmem:[%s4131_s1 + $0x80] sm:$0xff] }
   0x4   :  { %49 = vperm.xlu1 %3119, %v3299_v3  }
   0x6   :  { %3118 = vset.pattern.permute.xlu0 %v3208_v5 }
   0x7   :  { %43 = vperm.xlu0 %3118, %v3304_v4  }
   0x8   :  { %3120 = vset.pattern.permute.xlu1 %v3209_v6 }
   0x9   :  { %482 = vperm.xlu1 %3120, %v3296_v0  }
   0xa   :  { %7 = vsyncpa [#allocation3], 0  ;;  %v3210_v9 = vmov 25   ;;  %v2638_v10 = vpack.c.bf16 %v56_v8, %v55_v7  ;;  %v57_v11 = vld [vmem:[%s4131_s1 + $0x90] sm:$0xff]  ;;  %v58_v12 = vld [vmem:[%s4131_s1 + $0x98] sm:$0xff]  ;;  %v3211_v13 = vmov 23  }
   0xb   :  { %3122 = vset.pattern.permute.xlu0 %v3210_v9  ;;  %v3323_v14 = vadd.s32 124, %v3296_v0  ;;  %v3212_v15 = vmov 0.0|0.0   ;;  %v2641_v16 = vpack.c.bf16 %v58_v12, %v57_v11  ;;  %v3213_v17 = vmov 1   ;;  %v59_v18 = vld [vmem:[%s4131_s1 + $0xa0] sm:$0xff]  ;;  %v60_v19 = vld [vmem:[%s4131_s1 + $0xa8] sm:$0xff]  ;;  %v61_v24 = vld [vmem:[%s4131_s1 + $0xb0] sm:$0xff] }
   0xc   :  { %491 = vperm.xlu0 %3122, %v3299_v3   ;;  %2637 = vmatprep.subr.bf16.mxu0 %v3212_v15  ;;  %v3214_v20 = vmov 12   ;;  %v2644_v21 = vpack.c.bf16 %v60_v19, %v59_v18  ;;  %vm3215_vm0 = vmmov 0   ;;  %v3216_v22 = vmov 0.0   ;;  %v62_v25 = vld [vmem:[%s4131_s1 + $0xb8] sm:$0xff]  ;;  %v63_v31 = vld [vmem:[%s4131_s1 + $0xc0] sm:$0xff]  ;;  %v64_v32 = vld [vmem:[%s4131_s1 + $0xc8] sm:$0xff] }
   0xd   :  { %3121 = vset.pattern.permute.xlu1 %v3211_v13  ;;  %2639 = vmatpush3.bf16.msra.mxu0 %v2638_v10  ;;  %v3217_v23 = vmov 17   ;;  %v3218_v26 = vmov 28   ;;  %v3352_v27 = vadd.s32 90, %v3296_v0  ;;  %v2647_v28 = vpack.c.bf16 %v62_v25, %v61_v24  ;;  %v65_v36 = vld [vmem:[%s4131_s1 + $0xd0] sm:$0xff]  ;;  %v66_v37 = vld [vmem:[%s4131_s1 + $0xd8] sm:$0xff]  ;;  %v67_v42 = vld [vmem:[%s4131_s1 + $0xe0] sm:$0xff] }
   0xe   :  { %486 = vperm.xlu1 %3121, %v3304_v4   ;;  %2733 = vmatprep.subr.bf16.mxu1 %v3212_v15  ;;  %v3356_v29 = vadd.s32 102, %v3296_v0  ;;  %v3219_v30 = vmov 19   ;;  %v3220_v33 = vmov 2   ;;  %v2650_v34 = vpack.c.bf16 %v64_v32, %v63_v31  ;;  %v68_v43 = vld [vmem:[%s4131_s1 + $0xe8] sm:$0xff]  ;;  %v69_v49 = vld [vmem:[%s4131_s1 + $0xf0] sm:$0xff]  ;;  %v70_v50 = vld [vmem:[%s4131_s1 + $0xf8] sm:$0xff] }
   0xf   :  { %2640 = vmatprep.subr.bf16.mxu0 %v3212_v15  ;;  %2735 = vmatpush3.bf16.msra.mxu1 %v2638_v10  ;;  %v3221_v35 = vmov 27   ;;  %v3222_v38 = vmov 3   ;;  %v3378_v39 = vadd.s32 29, %v3296_v0  ;;  %v2653_v40 = vpack.c.bf16 %v66_v37, %v65_v36  ;;  %v21_v36 = vld [vmem:[%s4131_s1] sm:$0xff]  ;;  %s3275_s20 = smov 64   ;;  %s3276_s21 = smov 96  }
  0x10   :  { %3125 = vset.pattern.permute.xlu0 %v3213_v17  ;;  %2736 = vmatprep.subr.bf16.mxu1 %v3212_v15  ;;  %v3223_v41 = vmov 8   ;;  %v3224_v44 = vmov 18   ;;  %v3391_v45 = vadd.s32 19, %v3296_v0  ;;  %v3394_v46 = vadd.s32 114, %v3296_v0  ;;  %s3277_s22 = smov [#allocation2]  }
  0x11   :  { %213 = vperm.xlu0 %3125, %v3323_v14   ;;  %2642 = vmatpush3.bf16.msra.mxu0 %v2641_v16  ;;  %v2656_v47 = vpack.c.bf16 %v68_v43, %v67_v42  ;;  %v3225_v48 = vmov 10   ;;  %v3226_v51 = vmov 4   ;;  %v3407_v52 = vpack.c.bf16 %v70_v50, %v69_v49  ;;  %v25_v49 = vld [vmem:[%s4131_s1 + $0x20] sm:$0xff]  ;;  %v26_v50 = vld [vmem:[%s4131_s1 + $0x28] sm:$0xff]  ;;  %s1773_s23 = sshll.u32 %s3277_s22, 4  ;;  %s1774_s23 = int_to_ptr.vmem [resolvable:$true] %s1773_s23 }
  0x12   :  { %3123 = vset.pattern.permute.xlu1 %v3214_v20  ;;  %2643 = vmatprep.subr.bf16.mxu0 %v3212_v15  ;;  %v3227_v53 = vmov 26   ;;  %v3228_v54 = vmov 11   ;;  %v3229_v55 = vmov 15   ;;  %v3230_v56 = vmov 20   ;;  %s3182_s24 = scalar_lea.vmem %s1774_s23, 128  ;;  %p3187_p1 = scmp.lt.s32.totalorder %s1774_s23, %s1774_s23 }
  0x13   :  { %16 = vperm.xlu1 %3123, %v3296_v0   ;;  %2738 = vmatpush3.bf16.msra.mxu1 %v2641_v16  ;;  %v328_v57 = vadd.s32 7, %v3296_v0  ;;  %v3231_v58 = vmov 32   ;;  %v3232_v59 = vmov 5   ;;  %v3421_v60 = vadd.s32 13, %v3296_v0  ;;  %p3183_p0 = scmp.ne.s32.totalorder %s1774_s23, %s3182_s24  ;;  %p3188_p2 = scmp.lt.s32.totalorder %s3182_s24, %s3182_s24 }
  0x14   :  { %2739 = vmatprep.subr.bf16.mxu1 %v3212_v15  ;;  %2109 = vmatprep.mubr.msk.f32.mxu0 %vm3215_vm0, %v3216_v22  ;;  %v3233_v61 = vmov 48   ;;  %v3234_v62 = vmov 6   ;;  %v3235_v63 = vmov 44   ;;  %v3236_v1 = vmov 21  }
  0x15   :  { %3128 = vset.pattern.permute.xlu0 %v3217_v23  ;;  %2249 = vmatprep.mubr.msk.f32.mxu1 %vm3215_vm0, %v3216_v22  ;;  %v3237_v2 = vmov 34   ;;  %v3238_v5 = vmov 22   ;;  %v3239_v6 = vmov 50   ;;  %v3240_v7 = vmov 24   ;;  %p3189_p3 = por %p3188_p2, %p3187_p1 }
  0x16   :  { %654 = vperm.xlu0 %3128, %v3323_v14   ;;  %2645 = vmatpush3.bf16.msra.mxu0 %v2644_v21  ;;  %v3431_v8 = vadd.s32 31, %v3296_v0  ;;  %v3241_v9 = vmov 43   ;;  %v3242_v10 = vmov 13   ;;  %v357_v11 = vadd.s32 24, %v3296_v0 }
  0x17   :  { %3124 = vset.pattern.permute.xlu1 %v3218_v26  ;;  %2646 = vmatprep.subr.bf16.mxu0 %v3212_v15  ;;  %v3243_v12 = vmov 37   ;;  %v3244_v13 = vmov 14   ;;  %v3245_v16 = vmov 53   ;;  %v3246_v17 = vmov 29   ;;  %p3190_p4 = pnand %p3189_p3, %p3183_p0 }
  0x18   :  { %460 = vperm.xlu1 %3124, %v3296_v0   ;;  %2741 = vmatpush3.bf16.msra.mxu1 %v2644_v21  ;;  %v3247_v18 = vmov 56   ;;  %v3248_v19 = vmov 30   ;;  %v3249_v20 = vmov 46   ;;  %v3250_v21 = vmov 31  }
  0x19   :  { %2742 = vmatprep.subr.bf16.mxu1 %v3212_v15  ;;  %v3251_v23 = vmov 62   ;;  %v3252_v24 = vmov 39   ;;  %v3253_v25 = vmov 63   ;;  %v3254_v26 = vmov 41  }
  0x1a   :  { %3131 = vset.pattern.permute.xlu0 %v3219_v30  ;;  %2648 = vmatpush3.bf16.msra.mxu0 %v2647_v28  ;;  %v3257_v30 = vmov 60   ;;  %v13_v31 = vlaneseq  ;;  %v3259_v42 = vmov 35   ;;  %v3260_v43 = vmov 1.0  }
  0x1b   :  { %663 = vperm.xlu0 %3131, %v3356_v29   ;;  %2649 = vmatprep.subr.bf16.mxu0 %v3212_v15 }
  0x1c   :  { %3126 = vset.pattern.permute.xlu1 %v3220_v33  ;;  %2744 = vmatpush3.bf16.msra.mxu1 %v2647_v28  ;;  %v3256_v28 = vmov 57  }
  0x1d   :  { %218 = vperm.xlu1 %3126, %v3352_v27   ;;  %2745 = vmatprep.subr.bf16.mxu1 %v3212_v15 }
  0x1e   :  { %2651 = vmatpush3.bf16.msra.mxu0 %v2650_v34 }
  0x1f   :  { %3134 = vset.pattern.permute.xlu0 %v3221_v35  ;;  %2652 = vmatprep.subr.bf16.mxu0 %v3212_v15  ;;  %v3258_v35 = vmov 33  }
  0x20   :  { %673 = vperm.xlu0 %3134, %v3296_v0   ;;  %2747 = vmatpush3.bf16.msra.mxu1 %v2650_v34  ;;  %v3445_v34 = vand.u32 127, %v13_v31  ;;  %v246_v31 = vld [vmem:[%s4131_s1 + $0x128] sm:$0xff] }
  0x21   :  { %3127 = vset.pattern.permute.xlu1 %v3222_v38  ;;  %2748 = vmatprep.subr.bf16.mxu1 %v3212_v15 }
  0x22   :  { %224 = vperm.xlu1 %3127, %v3356_v29   ;;  %2654 = vmatpush3.bf16.msra.mxu0 %v2653_v40 }
  0x23   :  { %2655 = vmatprep.subr.bf16.mxu0 %v3212_v15 }
  0x24   :  { %3137 = vset.pattern.permute.xlu0 %v3223_v41  ;;  %2750 = vmatpush3.bf16.msra.mxu1 %v2653_v40  ;;  %v23_v40 = vld [vmem:[%s4131_s1 + $0x10] sm:$0xff]  ;;  %v24_v41 = vld [vmem:[%s4131_s1 + $0x18] sm:$0xff] }
  0x25   :  { %341 = vperm.xlu0 %3137, %v3378_v39   ;;  %2751 = vmatprep.subr.bf16.mxu1 %v3212_v15 }
  0x26   :  { %3129 = vset.pattern.permute.xlu1 %v3224_v44  ;;  %2657 = vmatpush3.bf16.msra.mxu0 %v2656_v47 }
  0x27   :  { %658 = vperm.xlu1 %3129, %v3352_v27   ;;  %2658 = vmatprep.subr.bf16.mxu0 %v3212_v15 }
  0x28   :  { %2753 = vmatpush3.bf16.msra.mxu1 %v2656_v47  ;;  %v3468_v47 = vpack.c.bf16 %v24_v41, %v23_v40  ;;  %v3269_v40 = vmov 42  }
  0x29   :  { %3140 = vset.pattern.permute.xlu0 %v3225_v48  ;;  %2754 = vmatprep.subr.bf16.mxu1 %v3212_v15 }
  0x2a   :  { %347 = vperm.xlu0 %3140, %v3391_v45   ;;  %2660 = vmatpush3.bf16.msra.mxu0 %v3407_v52 }
  0x2b   :  { %3130 = vset.pattern.permute.xlu1 %v3226_v51  ;;  %2661 = vmatprep.subr.bf16.mxu0 %v3212_v15  ;;  %v3261_v51 = vmov 49  }
  0x2c   :  { %230 = vperm.xlu1 %3130, %v3394_v46   ;;  %2756 = vmatpush3.bf16.msra.mxu1 %v3407_v52 }
  0x2d   :  { %2757 = vmatprep.subr.bf16.mxu1 %v3212_v15 }
  0x2e   :  { %3143 = vset.pattern.permute.xlu0 %v3227_v53  ;;  %v3484_v53 = vpack.c.bf16 %v26_v50, %v25_v49  ;;  %v3270_v50 = vmov 45  }
  0x2f   :  { %781 = vperm.xlu0 %3143, %v3391_v45  }
  0x30   :  { %3132 = vset.pattern.permute.xlu1 %v3228_v54  ;;  %v27_v54 = vld [vmem:[%s4131_s1 + $0x30] sm:$0xff] }
  0x31   :  { %235 = vperm.xlu1 %3132, %v3296_v0  }
  0x33   :  { %3146 = vset.pattern.permute.xlu0 %v3229_v55  ;;  %v28_v55 = vld [vmem:[%s4131_s1 + $0x38] sm:$0xff] }
  0x34   :  { %364 = vperm.xlu0 %3146, %v3296_v0  }
  0x35   :  { %3133 = vset.pattern.permute.xlu1 %v3230_v56 }
  0x36   :  { %668 = vperm.xlu1 %3133, %v3394_v46  }
  0x38   :  { %3149 = vset.pattern.permute.xlu0 %v3231_v58  ;;  %v29_v58 = vld [vmem:[%s4131_s1 + $0x40] sm:$0xff] }
  0x39   :  { %918 = vperm.xlu0 %3149, %v3296_v0  }
  0x3a   :  { %3135 = vset.pattern.permute.xlu1 %v3232_v59  ;;  %v30_v59 = vld [vmem:[%s4131_s1 + $0x48] sm:$0xff] }
  0x3b   :  { %330 = vperm.xlu1 %3135, %v328_v57  }
  0x3d   :  { %3152 = vset.pattern.permute.xlu0 %v3233_v61 }
  0x3e   :  { %1354 = vperm.xlu0 %3152, %v3296_v0  }
  0x3f   :  { %3136 = vset.pattern.permute.xlu1 %v3234_v62  ;;  %v3516_v62 = vpack.c.bf16 %v30_v59, %v29_v58  ;;  %v3271_v59 = vmov 58  }
  0x40   :  { %335 = vperm.xlu1 %3136, %v3421_v60  }
  0x42   :  { %3155 = vset.pattern.permute.xlu0 %v3235_v63  ;;  %v3263_v63 = vmov 51  }
  0x43   :  { %896 = vperm.xlu0 %3155, %v3296_v0  }
  0x44   :  { %3138 = vset.pattern.permute.xlu1 %v3236_v1  ;;  %v31_v1 = vld [vmem:[%s4131_s1 + $0x50] sm:$0xff] }
  0x45   :  { %767 = vperm.xlu1 %3138, %v328_v57  }
  0x47   :  { %3158 = vset.pattern.permute.xlu0 %v3237_v2  ;;  %v32_v2 = vld [vmem:[%s4131_s1 + $0x58] sm:$0xff] }
  0x48   :  { %1094 = vperm.xlu0 %3158, %v3352_v27  }
  0x49   :  { %3139 = vset.pattern.permute.xlu1 %v3238_v5 }
  0x4a   :  { %771 = vperm.xlu1 %3139, %v3421_v60  }
  0x4c   :  { %3161 = vset.pattern.permute.xlu0 %v3239_v6  ;;  %v3531_v6 = vpack.c.bf16 %v32_v2, %v31_v1 }
  0x4d   :  { %1530 = vperm.xlu0 %3161, %v3352_v27   ;;  %v3255_v27 = vmov 55  }
  0x4e   :  { %3141 = vset.pattern.permute.xlu1 %v3240_v7  ;;  %v33_v7 = vld [vmem:[%s4131_s1 + $0x60] sm:$0xff] }
  0x4f   :  { %776 = vperm.xlu1 %3141, %v3378_v39  }
  0x51   :  { %3164 = vset.pattern.permute.xlu0 %v3241_v9  ;;  %v34_v9 = vld [vmem:[%s4131_s1 + $0x68] sm:$0xff] }
  0x52   :  { %1109 = vperm.xlu0 %3164, %v3296_v0  }
  0x53   :  { %3142 = vset.pattern.permute.xlu1 %v3242_v10  ;;  %v3544_v10 = vpack.c.bf16 %v34_v9, %v33_v7  ;;  %v371_v9 = vld [vmem:[%s4131_s1 + $0x188] sm:$0xff] }
  0x54   :  { %353 = vperm.xlu1 %3142, %v3431_v8  }
  0x56   :  { %3167 = vset.pattern.permute.xlu0 %v3243_v12  ;;  %v35_v12 = vld [vmem:[%s4131_s1 + $0x70] sm:$0xff] }
  0x57   :  { %1203 = vperm.xlu0 %3167, %v328_v57  }
  0x58   :  { %3144 = vset.pattern.permute.xlu1 %v3244_v13  ;;  %v36_v13 = vld [vmem:[%s4131_s1 + $0x78] sm:$0xff] }
  0x59   :  { %359 = vperm.xlu1 %3144, %v357_v11  }
  0x5b   :  { %3170 = vset.pattern.permute.xlu0 %v3245_v16  ;;  %v3559_v16 = vpack.c.bf16 %v36_v13, %v35_v12 }
  0x5c   :  { %1639 = vperm.xlu0 %3170, %v328_v57   ;;  %v3501_v57 = vpack.c.bf16 %v28_v55, %v27_v54  ;;  %v253_v55 = vld [vmem:[%s4131_s1 + $0x160] sm:$0xff] }
  0x5d   :  { %3145 = vset.pattern.permute.xlu1 %v3246_v17  ;;  %v241_v17 = vld [vmem:[%s4131_s1 + $0x100] sm:$0xff] }
  0x5e   :  { %786 = vperm.xlu1 %3145, %v3431_v8  }
  0x60   :  { %3173 = vset.pattern.permute.xlu0 %v3247_v18  ;;  %v242_v18 = vld [vmem:[%s4131_s1 + $0x108] sm:$0xff] }
  0x61   :  { %1648 = vperm.xlu0 %3173, %v3378_v39  }
  0x62   :  { %3147 = vset.pattern.permute.xlu1 %v3248_v19 }
  0x63   :  { %791 = vperm.xlu1 %3147, %v357_v11  }
  0x65   :  { %3176 = vset.pattern.permute.xlu0 %v3249_v20  ;;  %v3266_v20 = vmov 38  }
  0x66   :  { %1227 = vperm.xlu0 %3176, %v357_v11  }
  0x67   :  { %3148 = vset.pattern.permute.xlu1 %v3250_v21  ;;  %v3573_v21 = vpack.c.bf16 %v242_v18, %v241_v17  ;;  %v3273_v18 = vmov 47  }
  0x68   :  { %796 = vperm.xlu1 %3148, %v3296_v0  }
  0x6a   :  { %3179 = vset.pattern.permute.xlu0 %v3251_v23  ;;  %v243_v23 = vld [vmem:[%s4131_s1 + $0x110] sm:$0xff] }
  0x6b   :  { %1663 = vperm.xlu0 %3179, %v357_v11  }
  0x6c   :  { %3150 = vset.pattern.permute.xlu1 %v3252_v24  ;;  %v244_v24 = vld [vmem:[%s4131_s1 + $0x118] sm:$0xff] }
  0x6d   :  { %922 = vperm.xlu1 %3150, %v3304_v4  }
  0x6f   :  { %3181 = vset.pattern.permute.xlu0 %v3253_v25 }
  0x71   :  { %3151 = vset.pattern.permute.xlu1 %v3254_v26 }
  0x72   :  { %927 = vperm.xlu1 %3151, %v3299_v3  }
  0x76   :  { %3153 = vset.pattern.permute.xlu1 %v3255_v27  ;;  %v3591_v27 = vpack.c.bf16 %v244_v24, %v243_v23  ;;  %v375_v23 = vld [vmem:[%s4131_s1 + $0x1a8] sm:$0xff] }
  0x77   :  { %1358 = vperm.xlu1 %3153, %v3304_v4   ;;  %v22_v4 = vld [vmem:[%s4131_s1 + $0x8] sm:$0xff] }
  0x78   :  { %v3456_v38 = vpack.c.bf16 %v22_v4, %v21_v36  ;;  %v3268_v36 = vmov 54  }
  0x7b   :  { %3154 = vset.pattern.permute.xlu1 %v3256_v28  ;;  %v3267_v28 = vmov 40  }
  0x7c   :  { %1363 = vperm.xlu1 %3154, %v3299_v3  }
  0x80   :  { %3156 = vset.pattern.permute.xlu1 %v3257_v30  ;;  %v245_v30 = vld [vmem:[%s4131_s1 + $0x120] sm:$0xff] }
  0x81   :  { %1332 = vperm.xlu1 %3156, %v3296_v0   ;;  %v39_v32 = vpop.permute.xlu0 %38 }
  0x82   :  { %vm40_vm1 = vcmp.eq.s32.totalorder %v39_v32, %v3445_v34 }
  0x83   :  { %v50_v33 = vpop.permute.xlu1 %49 }
  0x84   :  { %vm51_vm3 = vcmp.eq.s32.totalorder %v50_v33, %v3445_v34  ;;  %v3610_v33 = vpack.c.bf16 %v246_v31, %v245_v30  ;;  %v376_v30 = vld [vmem:[%s4131_s1 + $0x1b0] sm:$0xff]  ;;  %v377_v31 = vld [vmem:[%s4131_s1 + $0x1b8] sm:$0xff] }
  0x85   :  { %3157 = vset.pattern.permute.xlu1 %v3258_v35  ;;  %v247_v35 = vld [vmem:[%s4131_s1 + $0x130] sm:$0xff] }
  0x86   :  { %1090 = vperm.xlu1 %3157, %v3323_v14   ;;  %v44_v3 = vpop.permute.xlu0 %43 }
  0x87   :  { %vm45_vm2 = vcmp.eq.s32.totalorder %v44_v3, %v3445_v34  ;;  %v249_v3 = vld [vmem:[%s4131_s1 + $0x140] sm:$0xff] }
  0x88   :  { %v483_v37 = vpop.permute.xlu1 %482  ;;  %vm46_vm4 = vmor %vm40_vm1, %vm45_vm2 }
  0x89   :  { %vm52_vm5 = vmor %vm46_vm4, %vm51_vm3  ;;  %vm484_vm7 = vcmp.eq.s32.totalorder %v483_v37, %v3445_v34  ;;  %v250_v37 = vld [vmem:[%s4131_s1 + $0x148] sm:$0xff] }
  0x8a   :  { %3159 = vset.pattern.permute.xlu1 %v3259_v42  ;;  %2110 = vmatmul.mubr.msk.f32.vlgmr.msra.gmra.mrb[0].mxu0 %vm52_vm5, %v3260_v43  ;;  %v3641_v41 = vpack.c.bf16 %v250_v37, %v249_v3 }
  0x8b   :  { %1099 = vperm.xlu1 %3159, %v3356_v29   ;;  %2663 = vmatpush3.bf16.msra.mxu0 %v3456_v38  ;;  %v492_v44 = vpop.permute.xlu0 %491 }
  0x8c   :  { %2144 = vmatprep.mubr.msk.f32.mxu0 %vm3215_vm0, %v3216_v22  ;;  %2664 = vmatprep.subr.bf16.mxu0 %v3212_v15  ;;  %vm493_vm6 = vcmp.eq.s32.totalorder %v492_v44, %v3445_v34  ;;  %v251_v44 = vld [vmem:[%s4131_s1 + $0x150] sm:$0xff] }
  0x8d   :  { %v487_v48 = vpop.permute.xlu1 %486 }
  0x8e   :  { %vm488_vm8 = vcmp.eq.s32.totalorder %v487_v48, %v3445_v34  ;;  %v252_v48 = vld [vmem:[%s4131_s1 + $0x158] sm:$0xff] }
  0x8f   :  { %vm489_vm9 = vmor %vm484_vm7, %vm488_vm8  ;;  %3160 = vset.pattern.permute.xlu1 %v3261_v51  ;;  %2666 = vmatpush3.bf16.msra.mxu0 %v3468_v47  ;;  %v3655_v51 = vpack.c.bf16 %v252_v48, %v251_v44 }
  0x90   :  { %vm494_vm10 = vmor %vm489_vm9, %vm493_vm6  ;;  %1526 = vperm.xlu1 %3160, %v3323_v14   ;;  %2667 = vmatprep.subr.bf16.mxu0 %v3212_v15  ;;  %v3262_v14 = vmov 36   ;;  %v214_v42 = vpop.permute.xlu0 %213 }
  0x91   :  { %2250 = vmatmul.mubr.msk.f32.vlgmr.msra.gmra.mrb[0].mxu1 %vm494_vm10, %v3260_v43  ;;  %vm215_vm14 = vcmp.eq.s32.totalorder %v214_v42, %v3445_v34 }
  0x92   :  { %2759 = vmatpush3.bf16.msra.mxu1 %v3456_v38  ;;  %v3495_v56 = vpop.permute.xlu1 %16  ;;  %2284 = vmatprep.mubr.msk.f32.mxu1 %vm3215_vm0, %v3216_v22 }
  0x93   :  { %2760 = vmatprep.subr.bf16.mxu1 %v3212_v15  ;;  %2669 = vmatpush3.bf16.msra.mxu0 %v3484_v53  ;;  %vm18_vm11 = vcmp.eq.s32.totalorder %v3495_v56, %v3445_v34  ;;  %v254_v56 = vld [vmem:[%s4131_s1 + $0x168] sm:$0xff] }
  0x94   :  { %3162 = vset.pattern.permute.xlu1 %v3262_v14  ;;  %2670 = vmatprep.subr.bf16.mxu0 %v3212_v15  ;;  %v3673_v58 = vpack.c.bf16 %v254_v56, %v253_v55  ;;  %v384_v56 = vld [vmem:[%s4131_s1 + $0x1f0] sm:$0xff] }
  0x95   :  { %1104 = vperm.xlu1 %3162, %v3394_v46   ;;  %v655_v54 = vpop.permute.xlu0 %654 }
  0x96   :  { %2762 = vmatpush3.bf16.msra.mxu1 %v3468_v47  ;;  %vm656_vm3 = vcmp.eq.s32.totalorder %v655_v54, %v3445_v34 }
  0x97   :  { %2763 = vmatprep.subr.bf16.mxu1 %v3212_v15  ;;  %v3513_v61 = vpop.permute.xlu1 %460  ;;  %2672 = vmatpush3.bf16.msra.mxu0 %v3501_v57 }
  0x98   :  { %2673 = vmatprep.subr.bf16.mxu0 %v3212_v15  ;;  %vm462_vm12 = vcmp.eq.s32.totalorder %v3513_v61, %v3445_v34  ;;  %v255_v61 = vld [vmem:[%s4131_s1 + $0x170] sm:$0xff] }
  0x99   :  { %3163 = vset.pattern.permute.xlu1 %v3263_v63  ;;  %v256_v63 = vld [vmem:[%s4131_s1 + $0x178] sm:$0xff] }
  0x9a   :  { %2765 = vmatpush3.bf16.msra.mxu1 %v3484_v53  ;;  %1535 = vperm.xlu1 %3163, %v3356_v29   ;;  %v3264_v29 = vmov 52   ;;  %v664_v1 = vpop.permute.xlu0 %663 }
  0x9b   :  { %2766 = vmatprep.subr.bf16.mxu1 %v3212_v15  ;;  %2675 = vmatpush3.bf16.msra.mxu0 %v3516_v62  ;;  %vm665_vm9 = vcmp.eq.s32.totalorder %v664_v1, %v3445_v34  ;;  %v934_v1 = vld [vmem:[%s4131_s1 + $0x88] sm:$0xff] }
  0x9c   :  { %v3529_v5 = vpop.permute.xlu1 %218  ;;  %2676 = vmatprep.subr.bf16.mxu0 %v3212_v15 }
  0x9d   :  { %vm220_vm13 = vcmp.eq.s32.totalorder %v3529_v5, %v3445_v34  ;;  %v3697_v5 = vpack.c.bf16 %v256_v63, %v255_v61  ;;  %v933_v63 = vld [vmem:[%s4131_s1 + $0x80] sm:$0xff] }
  0x9e   :  { %2768 = vmatpush3.bf16.msra.mxu1 %v3501_v57  ;;  %3165 = vset.pattern.permute.xlu1 %v3264_v29  ;;  %vm221_vm15 = vmor %vm215_vm14, %vm220_vm13  ;;  %v3272_v29 = vmov 61   ;;  %v2830_v7 = vpack.c.bf16 %v934_v1, %v933_v63 }
  0x9f   :  { %1540 = vperm.xlu1 %3165, %v3394_v46   ;;  %2769 = vmatprep.subr.bf16.mxu1 %v3212_v15  ;;  %v3265_v46 = vmov 59  }
  0xa0   :  { %2678 = vmatpush3.bf16.msra.mxu0 %v3531_v6 }
  0xa1   :  { %2679 = vmatprep.subr.bf16.mxu0 %v3212_v15  ;;  %v3547_v11 = vpop.permute.xlu1 %224 }
  0xa2   :  { %2771 = vmatpush3.bf16.msra.mxu1 %v3516_v62  ;;  %vm226_vm1 = vcmp.eq.s32.totalorder %v3547_v11, %v3445_v34  ;;  %v674_v11 = vpop.permute.xlu0 %673 }
  0xa3   :  { %3166 = vset.pattern.permute.xlu1 %v3265_v46  ;;  %2772 = vmatprep.subr.bf16.mxu1 %v3212_v15  ;;  %vm227_vm5 = vmor %vm221_vm15, %vm226_vm1  ;;  %v372_v46 = vld [vmem:[%s4131_s1 + $0x190] sm:$0xff]  ;;  %vm675_vm14 = vcmp.eq.s32.totalorder %v674_v11, %v3445_v34 }
  0xa4   :  { %2681 = vmatpush3.bf16.msra.mxu0 %v3544_v10  ;;  %1545 = vperm.xlu1 %3166, %v3296_v0  }
  0xa5   :  { %2682 = vmatprep.subr.bf16.mxu0 %v3212_v15 }
  0xa6   :  { %2774 = vmatpush3.bf16.msra.mxu1 %v3531_v6  ;;  %v3569_v19 = vpop.permute.xlu1 %658 }
  0xa7   :  { %2775 = vmatprep.subr.bf16.mxu1 %v3212_v15  ;;  %vm660_vm2 = vcmp.eq.s32.totalorder %v3569_v19, %v3445_v34 }
  0xa8   :  { %2684 = vmatpush3.bf16.msra.mxu0 %v3559_v16  ;;  %3168 = vset.pattern.permute.xlu1 %v3266_v20  ;;  %vm3699_vm7 = vmor %vm656_vm3, %vm660_vm2  ;;  %v374_v20 = vld [vmem:[%s4131_s1 + $0x1a0] sm:$0xff] }
  0xa9   :  { %1207 = vperm.xlu1 %3168, %v3421_v60   ;;  %2685 = vmatprep.subr.bf16.mxu0 %v3212_v15 }
  0xaa   :  { %2777 = vmatpush3.bf16.msra.mxu1 %v3544_v10 }
  0xab   :  { %2145 = vmatmul.mubr.msk.f32.vlgmr.msra.gmra.mrb[0].mxu0 %vm18_vm11, %v3260_v43  ;;  %v3587_v26 = vpop.permute.xlu1 %230  ;;  %2778 = vmatprep.subr.bf16.mxu1 %v3212_v15 }
  0xac   :  { %2687 = vmatpush3.bf16.msra.mxu0 %v3573_v21  ;;  %2179 = vmatprep.mubr.msk.f32.mxu0 %vm3215_vm0, %v3216_v22  ;;  %vm232_vm4 = vcmp.eq.s32.totalorder %v3587_v26, %v3445_v34 }
  0xad   :  { %3169 = vset.pattern.permute.xlu1 %v3267_v28  ;;  %2688 = vmatprep.subr.bf16.mxu0 %v3212_v15  ;;  %vm233_vm8 = vmor %vm227_vm5, %vm232_vm4  ;;  %v3754_v28 = vpack.c.bf16 %v375_v23, %v374_v20  ;;  %v940_v20 = vld [vmem:[%s4131_s1 + $0xb8] sm:$0xff] }
  0xae   :  { %2780 = vmatpush3.bf16.msra.mxu1 %v3559_v16  ;;  %1212 = vperm.xlu1 %3169, %v3378_v39   ;;  %v248_v39 = vld [vmem:[%s4131_s1 + $0x138] sm:$0xff] }
  0xaf   :  { %2781 = vmatprep.subr.bf16.mxu1 %v3212_v15  ;;  %v3624_v4 = vpack.c.bf16 %v248_v39, %v247_v35  ;;  %v378_v39 = vld [vmem:[%s4131_s1 + $0x1c0] sm:$0xff] }
  0xb0   :  { %2690 = vmatpush3.bf16.msra.mxu0 %v3591_v27  ;;  %v3608_v32 = vpop.permute.xlu1 %235 }
  0xb1   :  { %2285 = vmatmul.mubr.msk.f32.vlgmr.msra.gmra.mrb[0].mxu1 %vm462_vm12, %v3260_v43  ;;  %2691 = vmatprep.subr.bf16.mxu0 %v3212_v15  ;;  %vm237_vm6 = vcmp.eq.s32.totalorder %v3608_v32, %v3445_v34  ;;  %vm666_vm12 = vmor %vm3699_vm7, %vm665_vm9  ;;  %v342_v32 = vpop.permute.xlu0 %341 }
  0xb2   :  { %2783 = vmatpush3.bf16.msra.mxu1 %v3573_v21  ;;  %3171 = vset.pattern.permute.xlu1 %v3268_v36  ;;  %vm238_vm10 = vmor %vm233_vm8, %vm237_vm6  ;;  %vm343_vm3 = vcmp.eq.s32.totalorder %v342_v32, %v3445_v34 }
  0xb3   :  { %1643 = vperm.xlu1 %3171, %v3421_v60   ;;  %2784 = vmatprep.subr.bf16.mxu1 %v3212_v15  ;;  %v1785_v17 = vsel %vm238_vm10, 1.0, %v3216_v22 }
  0xb4   :  { %2693 = vmatpush3.bf16.msra.mxu0 %v3610_v33  ;;  %2319 = vmatprep.mubr.msk.f32.mxu1 %vm3215_vm0, %v3216_v22 }
  0xb5   :  { %2694 = vmatprep.subr.bf16.mxu0 %v3212_v15  ;;  %v3635_v60 = vpop.permute.xlu1 %668  ;;  %v348_v37 = vpop.permute.xlu0 %347 }
  0xb6   :  { %2786 = vmatpush3.bf16.msra.mxu1 %v3591_v27  ;;  %vm670_vm11 = vcmp.eq.s32.totalorder %v3635_v60, %v3445_v34  ;;  %v380_v60 = vld [vmem:[%s4131_s1 + $0x1d0] sm:$0xff]  ;;  %vm349_vm6 = vcmp.eq.s32.totalorder %v348_v37, %v3445_v34  ;;  %v945_v37 = vld [vmem:[%s4131_s1 + $0xe0] sm:$0xff] }
  0xb7   :  { %3172 = vset.pattern.permute.xlu1 %v3269_v40  ;;  %2787 = vmatprep.subr.bf16.mxu1 %v3212_v15  ;;  %vm671_vm13 = vmor %vm666_vm12, %vm670_vm11  ;;  %v381_v40 = vld [vmem:[%s4131_s1 + $0x1d8] sm:$0xff] }
  0xb8   :  { %2696 = vmatpush3.bf16.msra.mxu0 %v3624_v4  ;;  %1217 = vperm.xlu1 %3172, %v3391_v45   ;;  %vm676_vm15 = vmor %vm671_vm13, %vm675_vm14  ;;  %v3798_v42 = vpack.c.bf16 %v381_v40, %v380_v60  ;;  %v946_v60 = vld [vmem:[%s4131_s1 + $0xe8] sm:$0xff] }
  0xb9   :  { %2697 = vmatprep.subr.bf16.mxu0 %v3212_v15  ;;  %v1791_v26 = vsel %vm676_vm15, 1.0, %v3216_v22  ;;  %v782_v44 = vpop.permute.xlu0 %781  ;;  %v2848_v40 = vpack.c.bf16 %v946_v60, %v945_v37 }
  0xba   :  { %2789 = vmatpush3.bf16.msra.mxu1 %v3610_v33  ;;  %v3651_v49 = vpop.permute.xlu1 %330 }
  0xbb   :  { %2790 = vmatprep.subr.bf16.mxu1 %v3212_v15  ;;  %vm332_vm1 = vcmp.eq.s32.totalorder %v3651_v49, %v3445_v34  ;;  %v382_v49 = vld [vmem:[%s4131_s1 + $0x1e0] sm:$0xff] }
  0xbc   :  { %2699 = vmatpush3.bf16.msra.mxu0 %v3641_v41  ;;  %3174 = vset.pattern.permute.xlu1 %v3270_v50  ;;  %v383_v50 = vld [vmem:[%s4131_s1 + $0x1e8] sm:$0xff] }
  0xbd   :  { %1222 = vperm.xlu1 %3174, %v3431_v8   ;;  %2700 = vmatprep.subr.bf16.mxu0 %v3212_v15  ;;  %v3812_v54 = vpack.c.bf16 %v383_v50, %v382_v49  ;;  %v365_v55 = vpop.permute.xlu0 %364  ;;  %v1383_v50 = vld [vmem:[%s4131_s1 + $0xf0] sm:$0xff] }
  0xbe   :  { %2792 = vmatpush3.bf16.msra.mxu1 %v3624_v4  ;;  %vm366_vm15 = vcmp.eq.s32.totalorder %v365_v55, %v3445_v34  ;;  %v1384_v55 = vld [vmem:[%s4131_s1 + $0xf8] sm:$0xff] }
  0xbf   :  { %2793 = vmatprep.subr.bf16.mxu1 %v3212_v15  ;;  %v3671_v14 = vpop.permute.xlu1 %335 }
  0xc0   :  { %2702 = vmatpush3.bf16.msra.mxu0 %v3655_v51  ;;  %vm337_vm2 = vcmp.eq.s32.totalorder %v3671_v14, %v3445_v34  ;;  %v385_v14 = vld [vmem:[%s4131_s1 + $0x1f8] sm:$0xff] }
  0xc1   :  { %3175 = vset.pattern.permute.xlu1 %v3271_v59  ;;  %2703 = vmatprep.subr.bf16.mxu0 %v3212_v15  ;;  %vm338_vm4 = vmor %vm332_vm1, %vm337_vm2  ;;  %v3832_v61 = vpack.c.bf16 %v385_v14, %v384_v56  ;;  %v2947_v14 = vpack.c.bf16 %v1384_v55, %v1383_v50 }
  0xc2   :  { %2795 = vmatpush3.bf16.msra.mxu1 %v3641_v41  ;;  %1653 = vperm.xlu1 %3175, %v3391_v45   ;;  %v370_v45 = vld [vmem:[%s4131_s1 + $0x180] sm:$0xff]  ;;  %vm344_vm5 = vmor %vm338_vm4, %vm343_vm3  ;;  %vm783_vm3 = vcmp.eq.s32.totalorder %v782_v44, %v3445_v34  ;;  %v919_v44 = vpop.permute.xlu0 %918 }
  0xc3   :  { %2796 = vmatprep.subr.bf16.mxu1 %v3212_v15  ;;  %v3717_v12 = vpack.c.bf16 %v371_v9, %v370_v45  ;;  %vm350_vm9 = vmor %vm344_vm5, %vm349_vm6  ;;  %v935_v45 = vld [vmem:[%s4131_s1 + $0x90] sm:$0xff]  ;;  %v936_v9 = vld [vmem:[%s4131_s1 + $0x98] sm:$0xff] }
  0xc4   :  { %2705 = vmatpush3.bf16.msra.mxu0 %v3673_v58  ;;  %v3695_v2 = vpop.permute.xlu1 %767  ;;  %v2833_v11 = vpack.c.bf16 %v936_v9, %v935_v45  ;;  %v1341_v9 = vld [vmem:[%s4131_s1 + $0x20] sm:$0xff] }
  0xc5   :  { %2706 = vmatprep.subr.bf16.mxu0 %v3212_v15  ;;  %vm769_vm10 = vcmp.eq.s32.totalorder %v3695_v2, %v3445_v34 }
  0xc6   :  { %2798 = vmatpush3.bf16.msra.mxu1 %v3655_v51  ;;  %3177 = vset.pattern.permute.xlu1 %v3272_v29  ;;  %v1355_v49 = vpop.permute.xlu0 %1354 }
  0xc7   :  { %1658 = vperm.xlu1 %3177, %v3431_v8   ;;  %2799 = vmatprep.subr.bf16.mxu1 %v3212_v15  ;;  %v373_v8 = vld [vmem:[%s4131_s1 + $0x198] sm:$0xff] }
  0xc8   :  { %2708 = vmatpush3.bf16.msra.mxu0 %v3697_v5  ;;  %v3735_v19 = vpack.c.bf16 %v373_v8, %v372_v46  ;;  %v938_v46 = vld [vmem:[%s4131_s1 + $0xa8] sm:$0xff] }
  0xc9   :  { %v3721_v13 = vpop.permute.xlu1 %771  ;;  %2709 = vmatprep.subr.bf16.mxu0 %v3212_v15 }
  0xca   :  { %2801 = vmatpush3.bf16.msra.mxu1 %v3673_v58  ;;  %vm773_vm11 = vcmp.eq.s32.totalorder %v3721_v13, %v3445_v34  ;;  %v937_v13 = vld [vmem:[%s4131_s1 + $0xa0] sm:$0xff] }
  0xcb   :  { %2180 = vmatmul.mubr.f32.vlgmr.msra.gmra.mrb[0].mxu0 %v1785_v17  ;;  %3178 = vset.pattern.permute.xlu1 %v3273_v18  ;;  %vm774_vm1 = vmor %vm769_vm10, %vm773_vm11  ;;  %v2836_v17 = vpack.c.bf16 %v938_v46, %v937_v13  ;;  %v939_v18 = vld [vmem:[%s4131_s1 + $0xb0] sm:$0xff]  ;;  %v1344_v13 = vld [vmem:[%s4131_s1 + $0x38] sm:$0xff] }
  0xcc   :  { %2711 = vmatpush3.bf16.msra.mxu0 %v3717_v12  ;;  %1232 = vperm.xlu1 %3178, %v3296_v0  }
  0xcd   :  { %2802 = vmatprep.subr.bf16.mxu1 %v3212_v15  ;;  %2712 = vmatprep.subr.bf16.mxu0 %v3212_v15 }
  0xce   :  { %2804 = vmatpush3.bf16.msra.mxu1 %v3697_v5  ;;  %v3746_v24 = vpop.permute.xlu1 %776  ;;  %2214 = vmatprep.mubr.msk.f32.mxu0 %vm3215_vm0, %v3216_v22 }
  0xcf   :  { %2805 = vmatprep.subr.bf16.mxu1 %v3212_v15  ;;  %vm778_vm12 = vcmp.eq.s32.totalorder %v3746_v24, %v3445_v34  ;;  %v2839_v24 = vpack.c.bf16 %v940_v20, %v939_v18  ;;  %v1347_v20 = vld [vmem:[%s4131_s1 + $0x50] sm:$0xff] }
  0xd0   :  { %2714 = vmatpush3.bf16.msra.mxu0 %v3735_v19  ;;  %3180 = vset.pattern.permute.xlu1 %v3253_v25  ;;  %v3769_v25 = vpack.c.bf16 %v377_v31, %v376_v30  ;;  %vm779_vm2 = vmor %vm774_vm1, %vm778_vm12  ;;  %v942_v30 = vld [vmem:[%s4131_s1 + $0xc8] sm:$0xff] }
  0xd1   :  { %2320 = vmatmul.mubr.f32.vlgmr.msra.gmra.mrb[0].mxu1 %v1791_v26  ;;  %2715 = vmatprep.subr.bf16.mxu0 %v3212_v15  ;;  %v941_v26 = vld [vmem:[%s4131_s1 + $0xc0] sm:$0xff] }
  0xd2   :  { %2807 = vmatpush3.bf16.msra.mxu1 %v3717_v12  ;;  %1668 = vperm.xlu1 %3180, %v3296_v0   ;;  %v379_v0 = vld [vmem:[%s4131_s1 + $0x1c8] sm:$0xff]  ;;  %v2842_v32 = vpack.c.bf16 %v942_v30, %v941_v26  ;;  %v897_v26 = vpop.permute.xlu0 %896 }
  0xd3   :  { %v354_v35 = vpop.permute.xlu1 %353  ;;  %2808 = vmatprep.subr.bf16.mxu1 %v3212_v15  ;;  %2354 = vmatprep.mubr.msk.f32.mxu1 %vm3215_vm0, %v3216_v22  ;;  %v3781_v3 = vpack.c.bf16 %v379_v0, %v378_v39  ;;  %v944_v39 = vld [vmem:[%s4131_s1 + $0xd8] sm:$0xff] }
  0xd4   :  { %2717 = vmatpush3.bf16.msra.mxu0 %v3754_v28  ;;  %vm355_vm7 = vcmp.eq.s32.totalorder %v354_v35, %v3445_v34  ;;  %v943_v35 = vld [vmem:[%s4131_s1 + $0xd0] sm:$0xff] }
  0xd5   :  { %2718 = vmatprep.subr.bf16.mxu0 %v3212_v15  ;;  %vm356_vm13 = vmor %vm350_vm9, %vm355_vm7 }
  0xd6   :  { %2810 = vmatpush3.bf16.msra.mxu1 %v3735_v19  ;;  %vm784_vm7 = vmor %vm779_vm2, %vm783_vm3  ;;  %vm1356_vm3 = vcmp.eq.s32.totalorder %v1355_v49, %v3445_v34 }
  0xd7   :  { %2811 = vmatprep.subr.bf16.mxu1 %v3212_v15 }
  0xd8   :  { %2720 = vmatpush3.bf16.msra.mxu0 %v3769_v25  ;;  %v360_v36 = vpop.permute.xlu1 %359 }
  0xd9   :  { %2721 = vmatprep.subr.bf16.mxu0 %v3212_v15  ;;  %vm361_vm8 = vcmp.eq.s32.totalorder %v360_v36, %v3445_v34  ;;  %v2845_v36 = vpack.c.bf16 %v944_v39, %v943_v35 }
  0xda   :  { %2813 = vmatpush3.bf16.msra.mxu1 %v3754_v28  ;;  %vm362_vm14 = vmor %vm356_vm13, %vm361_vm8  ;;  %vm920_vm13 = vcmp.eq.s32.totalorder %v919_v44, %v3445_v34 }
  0xdb   :  { %2814 = vmatprep.subr.bf16.mxu1 %v3212_v15  ;;  %vm367_vm4 = vmor %vm362_vm14, %vm366_vm15 }
  0xdc   :  { %2723 = vmatpush3.bf16.msra.mxu0 %v3781_v3  ;;  %v1786_v29 = vsel %vm367_vm4, 1.0, %v3216_v22 }
  0xdd   :  { %v787_v48 = vpop.permute.xlu1 %786  ;;  %2724 = vmatprep.subr.bf16.mxu0 %v3212_v15 }
  0xde   :  { %2816 = vmatpush3.bf16.msra.mxu1 %v3769_v25  ;;  %vm788_vm5 = vcmp.eq.s32.totalorder %v787_v48, %v3445_v34 }
  0xdf   :  { %2817 = vmatprep.subr.bf16.mxu1 %v3212_v15  ;;  %vm789_vm9 = vmor %vm784_vm7, %vm788_vm5  ;;  %vm898_vm7 = vcmp.eq.s32.totalorder %v897_v26, %v3445_v34 }
  0xe0   :  { %2726 = vmatpush3.bf16.msra.mxu0 %v3798_v42 }
  0xe1   :  { %2727 = vmatprep.subr.bf16.mxu0 %v3212_v15 }
  0xe2   :  { %2819 = vmatpush3.bf16.msra.mxu1 %v3781_v3  ;;  %v792_v59 = vpop.permute.xlu1 %791 }
  0xe3   :  { %2820 = vmatprep.subr.bf16.mxu1 %v3212_v15  ;;  %vm793_vm6 = vcmp.eq.s32.totalorder %v792_v59, %v3445_v34  ;;  %v1337_v59 = vld [vmem:[%s4131_s1] sm:$0xff] }
  0xe4   :  { %2729 = vmatpush3.bf16.msra.mxu0 %v3812_v54  ;;  %vm794_vm10 = vmor %vm789_vm9, %vm793_vm6 }
  0xe5   :  { %2730 = vmatprep.subr.bf16.mxu0 %v3212_v15 }
  0xe6   :  { %2822 = vmatpush3.bf16.msra.mxu1 %v3798_v42 }
  0xe7   :  { %v797_v2 = vpop.permute.xlu1 %796  ;;  %2823 = vmatprep.subr.bf16.mxu1 %v3212_v15 }
  0xe8   :  { %2732 = vmatpush3.bf16.msra.mxu0 %v3832_v61  ;;  %vm798_vm8 = vcmp.eq.s32.totalorder %v797_v2, %v3445_v34  ;;  %v1339_v2 = vld [vmem:[%s4131_s1 + $0x10] sm:$0xff] }
  0xe9   :  { %2829 = vmatprep.subr.bf16.mxu0 %v3212_v15  ;;  %vm799_vm11 = vmor %vm794_vm10, %vm798_vm8 }
  0xea   :  { %2825 = vmatpush3.bf16.msra.mxu1 %v3812_v54  ;;  %v1792_v8 = vsel %vm799_vm11, 1.0, %v3216_v22 }
  0xeb   :  { %2215 = vmatmul.mubr.f32.vlgmr.msra.gmra.mrb[0].mxu0 %v1786_v29  ;;  %2826 = vmatprep.subr.bf16.mxu1 %v3212_v15 }
  0xec   :  { %2831 = vmatpush3.bf16.msra.mxu0 %v2830_v7  ;;  %2389 = vmatprep.mubr.msk.f32.mxu0 %vm3215_vm0, %v3216_v22  ;;  %v923_v23 = vpop.permute.xlu1 %922 }
  0xed   :  { %2832 = vmatprep.subr.bf16.mxu0 %v3212_v15  ;;  %vm924_vm12 = vcmp.eq.s32.totalorder %v923_v23, %v3445_v34  ;;  %v1348_v23 = vld [vmem:[%s4131_s1 + $0x58] sm:$0xff] }
  0xee   :  { %2828 = vmatpush3.bf16.msra.mxu1 %v3832_v61  ;;  %vm925_vm14 = vmor %vm920_vm13, %vm924_vm12 }
  0xef   :  { %2925 = vmatprep.subr.bf16.mxu1 %v3212_v15 }
  0xf0   :  { %2834 = vmatpush3.bf16.msra.mxu0 %v2833_v11 }
  0xf1   :  { %2355 = vmatmul.mubr.f32.vlgmr.msra.gmra.mrb[0].mxu1 %v1792_v8  ;;  %2835 = vmatprep.subr.bf16.mxu0 %v3212_v15  ;;  %v928_v31 = vpop.permute.xlu1 %927  ;;  %v1345_v8 = vld [vmem:[%s4131_s1 + $0x40] sm:$0xff] }
  0xf2   :  { %2927 = vmatpush3.bf16.msra.mxu1 %v2830_v7  ;;  %2529 = vmatprep.mubr.msk.f32.mxu1 %vm3215_vm0, %v3216_v22  ;;  %vm929_vm15 = vcmp.eq.s32.totalorder %v928_v31, %v3445_v34 }
  0xf3   :  { %2928 = vmatprep.subr.bf16.mxu1 %v3212_v15  ;;  %vm930_vm1 = vmor %vm925_vm14, %vm929_vm15 }
  0xf4   :  { %2837 = vmatpush3.bf16.msra.mxu0 %v2836_v17 }
  0xf5   :  { %2838 = vmatprep.subr.bf16.mxu0 %v3212_v15 }
  0xf6   :  { %2930 = vmatpush3.bf16.msra.mxu1 %v2833_v11  ;;  %v1359_v0 = vpop.permute.xlu1 %1358  ;;  %v1343_v11 = vld [vmem:[%s4131_s1 + $0x30] sm:$0xff] }
  0xf7   :  { %2931 = vmatprep.subr.bf16.mxu1 %v3212_v15  ;;  %vm1360_vm2 = vcmp.eq.s32.totalorder %v1359_v0, %v3445_v34 }
  0xf8   :  { %2840 = vmatpush3.bf16.msra.mxu0 %v2839_v24  ;;  %vm1361_vm4 = vmor %vm1356_vm3, %vm1360_vm2 }
  0xf9   :  { %2841 = vmatprep.subr.bf16.mxu0 %v3212_v15 }
  0xfa   :  { %2933 = vmatpush3.bf16.msra.mxu1 %v2836_v17  ;;  %v1346_v17 = vld [vmem:[%s4131_s1 + $0x48] sm:$0xff] }
  0xfb   :  { %2934 = vmatprep.subr.bf16.mxu1 %v3212_v15  ;;  %v1364_v48 = vpop.permute.xlu1 %1363 }
  0xfc   :  { %2843 = vmatpush3.bf16.msra.mxu0 %v2842_v32  ;;  %vm1365_vm5 = vcmp.eq.s32.totalorder %v1364_v48, %v3445_v34 }
  0xfd   :  { %2844 = vmatprep.subr.bf16.mxu0 %v3212_v15  ;;  %vm1366_vm6 = vmor %vm1361_vm4, %vm1365_vm5 }
  0xfe   :  { %2936 = vmatpush3.bf16.msra.mxu1 %v2839_v24 }
  0xff   :  { %2937 = vmatprep.subr.bf16.mxu1 %v3212_v15 }
 0x100   :  { %2846 = vmatpush3.bf16.msra.mxu0 %v2845_v36  ;;  %v3917_v56 = vpop.permute.xlu1 %1332 }
 0x101   :  { %2847 = vmatprep.subr.bf16.mxu0 %v3212_v15  ;;  %vm1334_vm8 = vcmp.eq.s32.totalorder %v3917_v56, %v3445_v34 }
 0x102   :  { %2939 = vmatpush3.bf16.msra.mxu1 %v2842_v32 }
 0x103   :  { %2940 = vmatprep.subr.bf16.mxu1 %v3212_v15 }
 0x104   :  { %2849 = vmatpush3.bf16.msra.mxu0 %v2848_v40 }
 0x105   :  { %2850 = vmatprep.subr.bf16.mxu0 %v3212_v15  ;;  %v3936_v63 = vpop.permute.xlu1 %1090 }
 0x106   :  { %2942 = vmatpush3.bf16.msra.mxu1 %v2845_v36  ;;  %vm1092_vm9 = vcmp.eq.s32.totalorder %v3936_v63, %v3445_v34 }
 0x107   :  { %2943 = vmatprep.subr.bf16.mxu1 %v3212_v15 }
 0x108   :  { %2852 = vmatpush3.bf16.msra.mxu0 %v3407_v52  ;;  %v1338_v52 = vld [vmem:[%s4131_s1 + $0x8] sm:$0xff] }
 0x109   :  { %2853 = vmatprep.subr.bf16.mxu0 %v3212_v15  ;;  %v2950_v1 = vpack.c.bf16 %v1338_v52, %v1337_v59 }
 0x10a   :  { %2945 = vmatpush3.bf16.msra.mxu1 %v2848_v40  ;;  %v3951_v45 = vpop.permute.xlu1 %1099 }
 0x10b   :  { %2390 = vmatmul.mubr.msk.f32.vlgmr.msra.gmra.mrb[2].mxu0 %vm930_vm1, %v3260_v43  ;;  %2946 = vmatprep.subr.bf16.mxu1 %v3212_v15  ;;  %vm1101_vm11 = vcmp.eq.s32.totalorder %v3951_v45, %v3445_v34 }
 0x10c   :  { %2855 = vmatpush3.bf16.msra.mxu0 %v3456_v38  ;;  %2424 = vmatprep.mubr.msk.f32.mxu0 %vm3215_vm0, %v3216_v22  ;;  %v1340_v38 = vld [vmem:[%s4131_s1 + $0x18] sm:$0xff] }
 0x10d   :  { %2856 = vmatprep.subr.bf16.mxu0 %v3212_v15  ;;  %v2953_v7 = vpack.c.bf16 %v1340_v38, %v1339_v2 }
 0x10e   :  { %2948 = vmatpush3.bf16.msra.mxu1 %v2947_v14 }
 0x10f   :  { %2949 = vmatprep.subr.bf16.mxu1 %v3212_v15  ;;  %v3970_v46 = vpop.permute.xlu1 %1526 }
 0x110   :  { %2858 = vmatpush3.bf16.msra.mxu0 %v3468_v47  ;;  %v1342_v47 = vld [vmem:[%s4131_s1 + $0x28] sm:$0xff]  ;;  %vm1528_vm15 = vcmp.eq.s32.totalorder %v3970_v46, %v3445_v34  ;;  %s3274_s1 = smov 32  }
 0x111   :  { %2530 = vmatmul.mubr.msk.f32.vlgmr.msra.gmra.mrb[2].mxu1 %vm1366_vm6, %v3260_v43  ;;  %2859 = vmatprep.subr.bf16.mxu0 %v3212_v15  ;;  %v2956_v29 = vpack.c.bf16 %v1342_v47, %v1341_v9 }
 0x112   :  { %2951 = vmatpush3.bf16.msra.mxu1 %v2950_v1  ;;  %2564 = vmatprep.mubr.msk.f32.mxu1 %vm3215_vm0, %v3216_v22 }
 0x113   :  { %2952 = vmatprep.subr.bf16.mxu1 %v3212_v15 }
 0x114   :  { %2861 = vmatpush3.bf16.msra.mxu0 %v3484_v53  ;;  %v2959_v53 = vpack.c.bf16 %v1344_v13, %v1343_v11  ;;  %v3981_v18 = vpop.permute.xlu1 %1104 }
 0x115   :  { %2862 = vmatprep.subr.bf16.mxu0 %v3212_v15  ;;  %vm1106_vm14 = vcmp.eq.s32.totalorder %v3981_v18, %v3445_v34 }
 0x116   :  { %2954 = vmatpush3.bf16.msra.mxu1 %v2953_v7 }
 0x117   :  { %2955 = vmatprep.subr.bf16.mxu1 %v3212_v15 }
 0x118   :  { %2864 = vmatpush3.bf16.msra.mxu0 %v3501_v57  ;;  %v2962_v57 = vpack.c.bf16 %v1346_v17, %v1345_v8 }
 0x119   :  { %2865 = vmatprep.subr.bf16.mxu0 %v3212_v15  ;;  %v3994_v24 = vpop.permute.xlu1 %1535 }
 0x11a   :  { %2957 = vmatpush3.bf16.msra.mxu1 %v2956_v29  ;;  %vm1537_vm5 = vcmp.eq.s32.totalorder %v3994_v24, %v3445_v34 }
 0x11b   :  { %2958 = vmatprep.subr.bf16.mxu1 %v3212_v15 }
 0x11c   :  { %2867 = vmatpush3.bf16.msra.mxu0 %v3516_v62  ;;  %v2965_v62 = vpack.c.bf16 %v1348_v23, %v1347_v20 }
 0x11d   :  { %2868 = vmatprep.subr.bf16.mxu0 %v3212_v15 }
 0x11e   :  { %2960 = vmatpush3.bf16.msra.mxu1 %v2959_v53 }
 0x11f   :  { %2961 = vmatprep.subr.bf16.mxu1 %v3212_v15 }
 0x120   :  { %2870 = vmatpush3.bf16.msra.mxu0 %v3531_v6  ;;  %v1541_v6 = vpop.permute.xlu1 %1540 }
 0x121   :  { %2871 = vmatprep.subr.bf16.mxu0 %v3212_v15 }
 0x122   :  { %2963 = vmatpush3.bf16.msra.mxu1 %v2962_v57 }
 0x123   :  { %2964 = vmatprep.subr.bf16.mxu1 %v3212_v15 }
 0x124   :  { %2873 = vmatpush3.bf16.msra.mxu0 %v3544_v10 }
 0x125   :  { %2874 = vmatprep.subr.bf16.mxu0 %v3212_v15 }
 0x126   :  { %2966 = vmatpush3.bf16.msra.mxu1 %v2965_v62 }
 0x127   :  { %2967 = vmatprep.subr.bf16.mxu1 %v3212_v15 }
 0x128   :  { %2876 = vmatpush3.bf16.msra.mxu0 %v3559_v16 }
 0x129   :  { %2877 = vmatprep.subr.bf16.mxu0 %v3212_v15 }
 0x12a   :  { %2969 = vmatpush3.bf16.msra.mxu1 %v3544_v10  ;;  %v1546_v10 = vpop.permute.xlu1 %1545 }
 0x12b   :  { %2425 = vmatmul.mubr.msk.f32.vlgmr.msra.gmra.mrb[2].mxu0 %vm898_vm7, %v3260_v43  ;;  %2970 = vmatprep.subr.bf16.mxu1 %v3212_v15 }
 0x12c   :  { %2879 = vmatpush3.bf16.msra.mxu0 %v3573_v21  ;;  %2459 = vmatprep.mubr.msk.f32.mxu0 %vm3215_vm0, %v3216_v22 }
 0x12d   :  { %2880 = vmatprep.subr.bf16.mxu0 %v3212_v15 }
 0x12e   :  { %2972 = vmatpush3.bf16.msra.mxu1 %v3559_v16  ;;  %v1095_v16 = vpop.permute.xlu0 %1094  ;;  %v4022_v30 = vpop.permute.xlu1 %1207 }
 0x12f   :  { %2973 = vmatprep.subr.bf16.mxu1 %v3212_v15  ;;  %vm1096_vm10 = vcmp.eq.s32.totalorder %v1095_v16, %v3445_v34 }
 0x130   :  { %2882 = vmatpush3.bf16.msra.mxu0 %v3591_v27  ;;  %vm1097_vm12 = vmor %vm1092_vm9, %vm1096_vm10  ;;  %vm1547_vm10 = vcmp.eq.s32.totalorder %v1546_v10, %v3445_v34 }
 0x131   :  { %2565 = vmatmul.mubr.msk.f32.vlgmr.msra.gmra.mrb[2].mxu1 %vm1334_vm8, %v3260_v43  ;;  %2883 = vmatprep.subr.bf16.mxu0 %v3212_v15  ;;  %vm1102_vm13 = vmor %vm1097_vm12, %vm1101_vm11  ;;  %vm1542_vm8 = vcmp.eq.s32.totalorder %v1541_v6, %v3445_v34  ;;  %vm1209_vm12 = vcmp.eq.s32.totalorder %v4022_v30, %v3445_v34 }
 0x132   :  { %2975 = vmatpush3.bf16.msra.mxu1 %v3573_v21  ;;  %2599 = vmatprep.mubr.msk.f32.mxu1 %vm3215_vm0, %v3216_v22  ;;  %v1531_v43 = vpop.permute.xlu0 %1530  ;;  %v4035_v21 = vpop.permute.xlu1 %1212  ;;  %vm1107_vm2 = vmor %vm1102_vm13, %vm1106_vm14 }
 0x133   :  { %2976 = vmatprep.subr.bf16.mxu1 %v3212_v15  ;;  %vm1532_vm1 = vcmp.eq.s32.totalorder %v1531_v43, %v3445_v34 }
 0x134   :  { %2885 = vmatpush3.bf16.msra.mxu0 %v3610_v33  ;;  %vm1533_vm4 = vmor %vm1528_vm15, %vm1532_vm1 }
 0x135   :  { %2886 = vmatprep.subr.bf16.mxu0 %v3212_v15  ;;  %vm1538_vm7 = vmor %vm1533_vm4, %vm1537_vm5 }
 0x136   :  { %2978 = vmatpush3.bf16.msra.mxu1 %v3591_v27  ;;  %v1110_v27 = vpop.permute.xlu0 %1109  ;;  %vm1543_vm9 = vmor %vm1538_vm7, %vm1542_vm8 }
 0x137   :  { %2979 = vmatprep.subr.bf16.mxu1 %v3212_v15  ;;  %vm1111_vm3 = vcmp.eq.s32.totalorder %v1110_v27, %v3445_v34  ;;  %vm1548_vm11 = vmor %vm1543_vm9, %vm1547_vm10 }
 0x138   :  { %2888 = vmatpush3.bf16.msra.mxu0 %v3624_v4  ;;  %vm1112_vm6 = vmor %vm1107_vm2, %vm1111_vm3  ;;  %v1803_v32 = vsel %vm1548_vm11, 1.0, %v3216_v22 }
 0x139   :  { %2889 = vmatprep.subr.bf16.mxu0 %v3212_v15 }
 0x13a   :  { %2981 = vmatpush3.bf16.msra.mxu1 %v3610_v33  ;;  %v1644_v33 = vpop.permute.xlu1 %1643 }
 0x13b   :  { %2982 = vmatprep.subr.bf16.mxu1 %v3212_v15  ;;  %vm1645_vm15 = vcmp.eq.s32.totalorder %v1644_v33, %v3445_v34 }
 0x13c   :  { %2891 = vmatpush3.bf16.msra.mxu0 %v3641_v41 }
 0x13d   :  { %2892 = vmatprep.subr.bf16.mxu0 %v3212_v15 }
 0x13e   :  { %2984 = vmatpush3.bf16.msra.mxu1 %v3624_v4  ;;  %v1218_v4 = vpop.permute.xlu1 %1217 }
 0x13f   :  { %2985 = vmatprep.subr.bf16.mxu1 %v3212_v15  ;;  %vm1219_vm2 = vcmp.eq.s32.totalorder %v1218_v4, %v3445_v34 }
 0x140   :  { %2894 = vmatpush3.bf16.msra.mxu0 %v3655_v51 }
 0x141   :  { %2895 = vmatprep.subr.bf16.mxu0 %v3212_v15 }
 0x142   :  { %2987 = vmatpush3.bf16.msra.mxu1 %v3641_v41  ;;  %v1797_v41 = vsel %vm1112_vm6, 1.0, %v3216_v22  ;;  %v1223_v31 = vpop.permute.xlu1 %1222 }
 0x143   :  { %2988 = vmatprep.subr.bf16.mxu1 %v3212_v15  ;;  %vm1224_vm7 = vcmp.eq.s32.totalorder %v1223_v31, %v3445_v34 }
 0x144   :  { %2897 = vmatpush3.bf16.msra.mxu0 %v3673_v58 }
 0x145   :  { %2898 = vmatprep.subr.bf16.mxu0 %v3212_v15 }
 0x146   :  { %2990 = vmatpush3.bf16.msra.mxu1 %v3655_v51  ;;  %v1204_v51 = vpop.permute.xlu0 %1203 }
 0x147   :  { %2991 = vmatprep.subr.bf16.mxu1 %v3212_v15  ;;  %vm1205_vm13 = vcmp.eq.s32.totalorder %v1204_v51, %v3445_v34 }
 0x148   :  { %2900 = vmatpush3.bf16.msra.mxu0 %v3697_v5  ;;  %vm1210_vm14 = vmor %vm1205_vm13, %vm1209_vm12 }
 0x149   :  { %2901 = vmatprep.subr.bf16.mxu0 %v3212_v15 }
 0x14a   :  { %2993 = vmatpush3.bf16.msra.mxu1 %v3673_v58  ;;  %v1640_v58 = vpop.permute.xlu0 %1639 }
 0x14b   :  { %2460 = vmatmul.mubr.f32.vlgmr.msra.gmra.mrb[2].mxu0 %v1797_v41  ;;  %2994 = vmatprep.subr.bf16.mxu1 %v3212_v15  ;;  %vm1641_vm1 = vcmp.eq.s32.totalorder %v1640_v58, %v3445_v34 }
 0x14c   :  { %2903 = vmatpush3.bf16.msra.mxu0 %v3717_v12  ;;  %2494 = vmatprep.mubr.msk.f32.mxu0 %vm3215_vm0, %v3216_v22  ;;  %vm1646_vm4 = vmor %vm1641_vm1, %vm1645_vm15 }
 0x14d   :  { %2904 = vmatprep.subr.bf16.mxu0 %v3212_v15 }
 0x14e   :  { %2996 = vmatpush3.bf16.msra.mxu1 %v3697_v5  ;;  %v1654_v5 = vpop.permute.xlu1 %1653 }
 0x14f   :  { %2997 = vmatprep.subr.bf16.mxu1 %v3212_v15  ;;  %vm1655_vm8 = vcmp.eq.s32.totalorder %v1654_v5, %v3445_v34 }
 0x150   :  { %2906 = vmatpush3.bf16.msra.mxu0 %v3735_v19 }
 0x151   :  { %2600 = vmatmul.mubr.f32.vlgmr.msra.gmra.mrb[2].mxu1 %v1803_v32  ;;  %2907 = vmatprep.subr.bf16.mxu0 %v3212_v15 }
 0x152   :  { %2999 = vmatpush3.bf16.msra.mxu1 %v3717_v12  ;;  %2634 = vmatprep.mubr.msk.f32.mxu1 %vm3215_vm0, %v3216_v22  ;;  %vm1214_vm0 = vcmp.eq.s32.totalorder %v4035_v21, %v3445_v34  ;;  %v1649_v12 = vpop.permute.xlu0 %1648  ;;  %v1659_v35 = vpop.permute.xlu1 %1658 }
 0x153   :  { %3000 = vmatprep.subr.bf16.mxu1 %v3212_v15  ;;  %vm1215_vm3 = vmor %vm1210_vm14, %vm1214_vm0  ;;  %vm1650_vm5 = vcmp.eq.s32.totalorder %v1649_v12, %v3445_v34  ;;  %vm1660_vm13 = vcmp.eq.s32.totalorder %v1659_v35, %v3445_v34 }
 0x154   :  { %2909 = vmatpush3.bf16.msra.mxu0 %v3754_v28  ;;  %vm1220_vm6 = vmor %vm1215_vm3, %vm1219_vm2 }
 0x155   :  { %2910 = vmatprep.subr.bf16.mxu0 %v3212_v15  ;;  %vm1651_vm9 = vmor %vm1646_vm4, %vm1650_vm5 }
 0x156   :  { %3002 = vmatpush3.bf16.msra.mxu1 %v3735_v19  ;;  %v1228_v19 = vpop.permute.xlu0 %1227  ;;  %vm1225_vm10 = vmor %vm1220_vm6, %vm1224_vm7  ;;  %vm457_vm6 = vcmask 261120   ;;  %vm893_vm7 = vcmask 523520  }
 0x157   :  { %3003 = vmatprep.subr.bf16.mxu1 %v3212_v15  ;;  %vm1229_vm11 = vcmp.eq.s32.totalorder %v1228_v19, %v3445_v34  ;;  %vm1656_vm12 = vmor %vm1651_vm9, %vm1655_vm8  ;;  %vm1329_vm8 = vcmask 785920   ;;  %vm1765_vm9 = vcmask 1048320  }
 0x158   :  { %2912 = vmatpush3.bf16.msra.mxu0 %v3769_v25  ;;  %vm1230_vm14 = vmor %vm1225_vm10, %vm1229_vm11 }
 0x159   :  { %2913 = vmatprep.subr.bf16.mxu0 %v3212_v15  ;;  %vm1661_vm15 = vmor %vm1656_vm12, %vm1660_vm13 }
 0x15a   :  { %3005 = vmatpush3.bf16.msra.mxu1 %v3754_v28  ;;  %v1233_v28 = vpop.permute.xlu1 %1232 }
 0x15b   :  { %3006 = vmatprep.subr.bf16.mxu1 %v3212_v15  ;;  %vm1234_vm0 = vcmp.eq.s32.totalorder %v1233_v28, %v3445_v34 }
 0x15c   :  { %2915 = vmatpush3.bf16.msra.mxu0 %v3781_v3  ;;  %vm1235_vm1 = vmor %vm1230_vm14, %vm1234_vm0 }
 0x15d   :  { %2916 = vmatprep.subr.bf16.mxu0 %v3212_v15  ;;  %v1798_v39 = vsel %vm1235_vm1, 1.0, %v3216_v22 }
 0x15e   :  { %3008 = vmatpush3.bf16.msra.mxu1 %v3769_v25  ;;  %v1664_v25 = vpop.permute.xlu0 %1663 }
 0x15f   :  { %3009 = vmatprep.subr.bf16.mxu1 %v3212_v15  ;;  %vm1665_vm2 = vcmp.eq.s32.totalorder %v1664_v25, %v3445_v34 }
 0x160   :  { %2918 = vmatpush3.bf16.msra.mxu0 %v3798_v42  ;;  %vm1666_vm3 = vmor %vm1661_vm15, %vm1665_vm2 }
 0x161   :  { %2919 = vmatprep.subr.bf16.mxu0 %v3212_v15 }
 0x162   :  { %3011 = vmatpush3.bf16.msra.mxu1 %v3781_v3  ;;  %v1669_v3 = vpop.permute.xlu1 %1668 }
 0x163   :  { %3012 = vmatprep.subr.bf16.mxu1 %v3212_v15  ;;  %vm1670_vm4 = vcmp.eq.s32.totalorder %v1669_v3, %v3445_v34 }
 0x164   :  { %2921 = vmatpush3.bf16.msra.mxu0 %v3812_v54  ;;  %vm1671_vm5 = vmor %vm1666_vm3, %vm1670_vm4 }
 0x165   :  { %2922 = vmatprep.subr.bf16.mxu0 %v3212_v15 }
 0x166   :  { %3014 = vmatpush3.bf16.msra.mxu1 %v3798_v42  ;;  %v1804_v42 = vsel %vm1671_vm5, 1.0, %v3216_v22 }
 0x167   :  { %3015 = vmatprep.subr.bf16.mxu1 %v3212_v15 }
 0x168   :  { %2924 = vmatpush3.bf16.msra.mxu0 %v3832_v61 }
 0x16a   :  { %3017 = vmatpush3.bf16.msra.mxu1 %v3812_v54 }
 0x16b   :  { %2495 = vmatmul.mubr.f32.vlgmr.msra.gmra.mrb[2].mxu0 %v1798_v39  ;;  %3018 = vmatprep.subr.bf16.mxu1 %v3212_v15 }
 0x16e   :  { %3020 = vmatpush3.bf16.msra.mxu1 %v3832_v61 }
 0x171   :  { %2635 = vmatmul.mubr.f32.vlgmr.msra.gmra.mrb[2].mxu1 %v1804_v42 }
 0x1be   :  { %v452_v0 = vpop.f32.mrb[0].mxu0 }
 0x1bf   :  { %458 = vst.msk [vmem:[#allocation2] sm:$0xff] %vm457_vm6, %v452_v0  ;;  %v2216_v36 = vpop.f32.mrb[1].mxu0 }
 0x1c4   :  { %v884_v37 = vpop.f32.mrb[0].mxu1 }
 0x1c5   :  { %890 = vrot.lane.b32.xlu1 %v884_v37, %s3274_s1  ;;  %v2356_v60 = vpop.f32.mrb[1].mxu1 }
 0x237   :  { %v891_v34 = vpop.permute.xlu1 %890 }
 0x238   :  { %894 = vst.msk [vmem:[#allocation2] sm:$0xff] %vm893_vm7, %v891_v34 }
 0x23e   :  { %v1320_v54 = vpop.f32.mrb[2].mxu0 }
 0x23f   :  { %1326 = vrot.lane.b32.xlu0 %v1320_v54, %s3275_s20  ;;  %v2496_v15 = vpop.f32.mrb[3].mxu0 }
 0x244   :  { %v1756_v40 = vpop.f32.mrb[2].mxu1 }
 0x245   :  { %1762 = vrot.lane.b32.xlu1 %v1756_v40, %s3276_s21  ;;  %v2636_v22 = vpop.f32.mrb[3].mxu1 }
 0x2b1   :  { %v1327_v61 = vpop.permute.xlu0 %1326 }
 0x2b2   :  { %1330 = vst.msk [vmem:[#allocation2] sm:$0xff] %vm1329_vm8, %v1327_v61 }
 0x2b7   :  { %v1763_v44 = vpop.permute.xlu1 %1762 }
 0x2b8   :  { %1766 = vst.msk [vmem:[#allocation2] sm:$0xff] %vm1765_vm9, %v1763_v44 }
 0x2b9   :  { %3193 = shalt.err (!%p3190_p4)
}
 0x2ba   :  { %s3194_s27 = scalar_lea.hbm %s4132_s2, 128 }
 0x2bb   :  { %p3195_p5 = scmp.ne.s32.totalorder %s4132_s2, %s3194_s27  ;;  %p3198_p6 = scmp.lt.u32.totalorder %s3194_s27, %s4132_s2 }
 0x2bd   :  { %p3200_p7 = pnand %p3198_p6, %p3195_p5 }
 0x2bf   :  { %3203 = shalt.err (!%p3200_p7)
}
 0x2c0   :  { %1776 = dma.vmem_to_hbm [thread:$0]  %s1774_s23, 128, %s4132_s2, [#allocation3]  }
 0x2c1   :  { %3204 = dma.done.wait [#allocation3], 128  }
 0x2c2   :  { %3205 = vsyncadd [#allocation3], 4294967168 }
 0x2c3   :  { %1780 = vsyncpa [#allocation3], 1 }

</bundles_post_ra>
